<compile_context>
chip_gen: v7x
topology: tpu7x:2x2x1
jax: 0.10.0
libtpu: 0.0.40
codegen_flags: <defaults>
</compile_context>

<pallas_src>
from functools import partial

import jax
import jax.numpy as jnp
import numpy as np
from jax import lax
from jax.experimental import pallas as pl
from jax.experimental.pallas import tpu as pltpu


# ----------------------------------------------------------------------------
# One-time parameter preparation (hoisted out of the per-call forward)
# ----------------------------------------------------------------------------
def fold_bn(conv_bias, gamma, beta, running_mean, running_var, eps=1e-5):
    scale = gamma / jnp.sqrt(running_var + eps)
    shift = beta + scale * (conv_bias - running_mean)
    return scale[None, :].astype(jnp.float32), shift[None, :].astype(jnp.float32)


def prepare_params(params):
    """Constant prep: transposes + BN folding + gate reorder + im2col weight reshapes."""
    H = params["w_hh"].shape[1]
    # PyTorch LSTM gate row order is [i, f, g, o]; permute to [i, f, o, g] so that in-kernel
    # sigmoid applies to a contiguous [:, :3H] block and tanh only to [:, 3H:].
    perm = np.concatenate([np.arange(0, 2 * H), np.arange(3 * H, 4 * H),
                           np.arange(2 * H, 3 * H)])
    prep = {
        "wih_t": jnp.asarray(params["w_ih"])[perm, :].T,                 # (F, 4H)
        "whh_t": jnp.asarray(params["w_hh"])[perm, :].T,                 # (H, 4H)
        "b_row": (params["b_ih"] + params["b_hh"])[perm][None, :],       # (1, 4H)
    }
    # conv1 -> im2col weight matrix: row index = k*Cin + c, zero-padded rows to a round 32
    # so it matches the lane-padded patch matrix built in the wrapper.
    w1_kio = jnp.transpose(params["conv1_w"], (2, 1, 0))                 # (K1, Cin, C1)
    K1, Cin, C1 = w1_kio.shape
    kc = K1 * Cin
    kc_pad = ((kc + 31) // 32) * 32
    prep["w1"] = jnp.pad(w1_kio.reshape(kc, C1), ((0, kc_pad - kc), (0, 0)))
    prep["s1"], prep["t1"] = fold_bn(params["conv1_b"], params["bn1_g"],
                                     params["bn1_b"], params["bn1_m"], params["bn1_v"])
    # conv2/conv3 -> im2col weight matrices (K*Cin, Cout); these stay in HBM per-call and are
    # async-copied into VMEM scratch inside the kernel (overlapped with the LSTM).
    for i in (2, 3):
        w_kio = jnp.transpose(params[f"conv{i}_w"], (2, 1, 0))           # (K, Cin, Cout)
        K, Ci, Co = w_kio.shape
        prep[f"w{i}m"] = w_kio.reshape(K * Ci, Co)
        prep[f"s{i}"], prep[f"t{i}"] = fold_bn(params[f"conv{i}_b"], params[f"bn{i}_g"],
                                               params[f"bn{i}_b"], params[f"bn{i}_m"],
                                               params[f"bn{i}_v"])
    return prep


# ----------------------------------------------------------------------------
# Forward wrapper: one fused pallas_call
# ----------------------------------------------------------------------------
@partial(jax.jit, static_argnames=("ks",))
def rnn_fcn_backbone_forward(x_ncw, prep, ks):
    """Pallas forward of _RNN_FCN_Base_Backbone (eval mode, shuffle=True)."""
    K1, K2, K3 = ks
    B, c_in, L = x_ncw.shape
    T, F = c_in, L
    H = prep["whh_t"].shape[0]
    C1 = prep["w1"].shape[1]
    C2 = prep["w2m"].shape[1]
    C3 = prep["w3m"].shape[1]
    BP = ((B + 7) // 8) * 8                      # LSTM batch padded to a full sublane tile
    Lout1 = L - K1 + 1
    Lout2 = Lout1 - K2 + 1
    Lout3 = Lout2 - K3 + 1
    kc_pad = prep["w1"].shape[0]

    # ---- cheap XLA-side layout prep (tiny data, runs fused with the surrounding graph) ----
    # LSTM input, time-major, batch zero-padded so per-step gate extraction is 8-aligned.
    x_tbf = jnp.transpose(x_ncw, (1, 0, 2))                              # (T, B, F)
    x_lstm = jnp.pad(x_tbf, ((0, 0), (0, BP - B), (0, 0))).reshape(T * BP, F)

    # conv1 im2col patches for all batches, lane-padded to match prep["w1"].
    x_blc = jnp.transpose(x_ncw, (0, 2, 1))                              # (B, L, Cin)
    p1 = jnp.concatenate([x_blc[:, k:k + Lout1, :] for k in range(K1)], axis=-1)
    p1 = p1.reshape(B * Lout1, K1 * c_in)
    p1 = jnp.pad(p1, ((0, 0), (0, kc_pad - K1 * c_in)))                  # (B*Lout1, kc_pad)

    def kernel(x_lstm_ref, p1_ref,
               wih_ref, whh_ref, b_ref,
               w1_ref, s1_ref, t1_ref,
               w2_hbm, s2_ref, t2_ref,
               w3_hbm, s3_ref, t3_ref,
               out_ref,
               w2_vmem, w3_vmem, dma_sems):
        # Kick off the big conv-weight DMAs first; they complete under the LSTM + conv1.
        cp2 = pltpu.make_async_copy(w2_hbm, w2_vmem, dma_sems.at[0])
        cp3 = pltpu.make_async_copy(w3_hbm, w3_vmem, dma_sems.at[1])
        cp2.start()
        cp3.start()

        # -------------------- LSTM branch (serial critical path) --------------------
        wih = wih_ref[...]
        whh = whh_ref[...]
        bias = b_ref[...]
        # Single MXU push for every timestep's input projection (8-aligned per-step rows).
        xproj = jnp.dot(x_lstm_ref[...], wih,
                        preferred_element_type=jnp.float32) + bias       # (T*BP, 4H)
        h = jnp.zeros((BP, H), jnp.float32)
        c = jnp.zeros((BP, H), jnp.float32)
        for t in range(T):                                               # T tiny & static
            gates = xproj[t * BP:(t + 1) * BP, :] + jnp.dot(
                h, whh, preferred_element_type=jnp.float32)              # (BP, 4H)
            # gate columns pre-permuted to [i, f, o, g]
            sg = jax.nn.sigmoid(gates[:, :3 * H])
            gg = jnp.tanh(gates[:, 3 * H:])
            i_g = sg[:, 0:H]
            f_g = sg[:, H:2 * H]
            o_g = sg[:, 2 * H:3 * H]
            c = f_g * c + i_g * gg
            h = o_g * jnp.tanh(c)
        # rnn_dropout: identity in eval mode

        # -------------------- FCN branch (batched im2col matmuls) -------------------
        # conv1: patches built in the wrapper -> single matmul for all batches.
        h1 = jnp.dot(p1_ref[...], w1_ref[...], preferred_element_type=jnp.float32)
        h1 = jnp.maximum(h1 * s1_ref[...] + t1_ref[...], 0.0)            # (B*Lout1, C1)

        # conv2: one (B*Lout2, K2*C1) x (K2*C1, C2) matmul; weights arrive via async DMA.
        cp2.wait()
        slabs2 = [
            jnp.concatenate([h1[b * Lout1 + k:b * Lout1 + k + Lout2, :]
                             for b in range(B)], axis=0)                 # (B*Lout2, C1)
            for k in range(K2)]
        p2 = jnp.concatenate(slabs2, axis=-1)                            # (B*Lout2, K2*C1)
        h2 = jnp.dot(p2, w2_vmem[...], preferred_element_type=jnp.float32)
        h2 = jnp.maximum(h2 * s2_ref[...] + t2_ref[...], 0.0)            # (B*Lout2, C2)

        # conv3: one (B*Lout3, K3*C2) x (K3*C2, C3) matmul.
        cp3.wait()
        slabs3 = [
            jnp.concatenate([h2[b * Lout2 + k:b * Lout2 + k + Lout3, :]
                             for b in range(B)], axis=0)                 # (B*Lout3, C2)
            for k in range(K3)]
        p3 = jnp.concatenate(slabs3, axis=-1)                            # (B*Lout3, K3*C2)
        h3 = jnp.dot(p3, w3_vmem[...], preferred_element_type=jnp.float32)
        h3 = jnp.maximum(h3 * s3_ref[...] + t3_ref[...], 0.0)            # (B*Lout3, C3)

        # Global average pool over length (per batch).
        gap = jnp.concatenate(
            [jnp.mean(h3[b * Lout3:(b + 1) * Lout3, :], axis=0, keepdims=True)
             for b in range(B)], axis=0)                                 # (B, C3)

        # -------- fused Concat([last_hidden, gap], dim=1): two direct stores --------
        out_ref[:, :H] = h[:B, :]
        out_ref[:, H:] = gap

    vmem = pl.BlockSpec(memory_space=pltpu.MemorySpace.VMEM)
    anyspace = pl.BlockSpec(memory_space=pl.ANY)
    return pl.pallas_call(
        kernel,
        out_shape=jax.ShapeDtypeStruct((B, H + C3), jnp.float32),
        in_specs=[vmem, vmem,                 # x_lstm, conv1 patches
                  vmem, vmem, vmem,           # wih, whh, bias
                  vmem, vmem, vmem,           # w1, s1, t1
                  anyspace, vmem, vmem,       # w2m (HBM), s2, t2
                  anyspace, vmem, vmem],      # w3m (HBM), s3, t3
        out_specs=vmem,
        scratch_shapes=[pltpu.VMEM((K2 * C1, C2), jnp.float32),
                        pltpu.VMEM((K3 * C2, C3), jnp.float32),
                        pltpu.SemaphoreType.DMA((2,))],
    )(x_lstm, p1,
      prep["wih_t"], prep["whh_t"], prep["b_row"],
      prep["w1"], prep["s1"], prep["t1"],
      prep["w2m"], prep["s2"], prep["t2"],
      prep["w3m"], prep["s3"], prep["t3"])


# ----------------------------------------------------------------------------
# Pure-JAX reference (mirrors PyTorch eval-mode semantics) for verification
# ----------------------------------------------------------------------------
def reference_forward(x_ncw, params):
    B, c_in, L = x_ncw.shape
    H = params["w_hh"].shape[1]
    h = jnp.zeros((B, H), jnp.float32)
    c = jnp.zeros((B, H), jnp.float32)
    for t in range(c_in):
        g = (x_ncw[:, t, :] @ params["w_ih"].T + h @ params["w_hh"].T
             + params["b_ih"] + params["b_hh"])
        i = jax.nn.sigmoid(g[:, :H])
        f = jax.nn.sigmoid(g[:, H:2 * H])
        gg = jnp.tanh(g[:, 2 * H:3 * H])
        o = jax.nn.sigmoid(g[:, 3 * H:])
        c = f * c + i * gg
        h = o * jnp.tanh(c)
    last_out = h

    y = x_ncw
    for i in (1, 2, 3):
        y = lax.conv_general_dilated(
            y, params[f"conv{i}_w"], window_strides=(1,), padding="VALID",
            dimension_numbers=("NCH", "OIH", "NCH")) + params[f"conv{i}_b"][None, :, None]
        y = ((y - params[f"bn{i}_m"][None, :, None])
             / jnp.sqrt(params[f"bn{i}_v"][None, :, None] + 1e-5)
             * params[f"bn{i}_g"][None, :, None] + params[f"bn{i}_b"][None, :, None])
        y = jnp.maximum(y, 0.0)
    gap = jnp.mean(y, axis=2)
    return jnp.concatenate([last_out, gap], axis=1)


# ----------------------------------------------------------------------------
# Main
# ----------------------------------------------------------------------------
if __name__ == "__main__":
    B, C_IN, SEQ_LEN, HIDDEN = 2, 4, 16, 32
    CONV_LAYERS = [128, 256, 128]
    KS = (7, 5, 3)

    key = jax.random.PRNGKey(0)
    keys = iter(jax.random.split(key, 32))

    def rnd(shape, s=0.1):
        return jax.random.normal(next(keys), shape, jnp.float32) * s

    params = {
        # LSTM: input_size = seq_len (shuffle=True), hidden_size = HIDDEN
        "w_ih": rnd((4 * HIDDEN, SEQ_LEN)),
        "w_hh": rnd((4 * HIDDEN, HIDDEN)),
        "b_ih": rnd((4 * HIDDEN,)),
        "b_hh": rnd((4 * HIDDEN,)),
    }
    c_prev = C_IN
    for i, (cout, k) in enumerate(zip(CONV_LAYERS, KS), start=1):
        params[f"conv{i}_w"] = rnd((cout, c_prev, k))
        params[f"conv{i}_b"] = rnd((cout,))
        params[f"bn{i}_g"] = 1.0 + rnd((cout,))
        params[f"bn{i}_b"] = rnd((cout,))
        params[f"bn{i}_m"] = rnd((cout,))
        params[f"bn{i}_v"] = 1.0 + 0.5 * jax.nn.sigmoid(rnd((cout,), 1.0))
        c_prev = cout

    x = jax.random.normal(next(keys), (B, C_IN, SEQ_LEN), jnp.float32)

    prep = prepare_params(params)              # one-time constant prep (hoisted)
    out = rnn_fcn_backbone_forward(x, prep, ks=KS)
    out = jax.block_until_ready(out)

    ref = jax.block_until_ready(reference_forward(x, params))
    assert out.shape == (B, HIDDEN + CONV_LAYERS[-1]), out.shape
    np.testing.assert_allclose(np.asarray(out), np.asarray(ref), rtol=2e-3, atol=2e-3)

    print("KERNEL_OK")
</pallas_src>

<mosaic_0001>
module attributes {stable_mosaic.version = 11 : i64} {
  func.func @kernel(%arg0: memref<32x16xf32, #tpu.memory_space<vmem>>, %arg1: memref<20x32xf32, #tpu.memory_space<vmem>>, %arg2: memref<16x128xf32, #tpu.memory_space<vmem>>, %arg3: memref<32x128xf32, #tpu.memory_space<vmem>>, %arg4: memref<1x128xf32, #tpu.memory_space<vmem>>, %arg5: memref<32x128xf32, #tpu.memory_space<vmem>>, %arg6: memref<1x128xf32, #tpu.memory_space<vmem>>, %arg7: memref<1x128xf32, #tpu.memory_space<vmem>>, %arg8: memref<640x256xf32, #tpu.memory_space<any>>, %arg9: memref<1x256xf32, #tpu.memory_space<vmem>>, %arg10: memref<1x256xf32, #tpu.memory_space<vmem>>, %arg11: memref<768x128xf32, #tpu.memory_space<any>>, %arg12: memref<1x128xf32, #tpu.memory_space<vmem>>, %arg13: memref<1x128xf32, #tpu.memory_space<vmem>>, %arg14: memref<2x160xf32, #tpu.memory_space<vmem>>, %arg15: memref<640x256xf32, #tpu.memory_space<vmem>>, %arg16: memref<768x128xf32, #tpu.memory_space<vmem>>, %arg17: memref<2x!tpu.dma_semaphore, #tpu.memory_space<semaphore_mem>>) attributes {dimension_semantics = [], scalar_prefetch = 0 : i64, scratch_operands = 3 : i64, tpu.core_type = #tpu.core_type<tc>} {
    %c0_i32 = arith.constant 0 : i32
    %0 = tpu.memref_slice %arg17[%c0_i32] : memref<2x!tpu.dma_semaphore, #tpu.memory_space<semaphore_mem>> -> memref<1x!tpu.dma_semaphore, #tpu.memory_space<semaphore_mem>>
    %1 = tpu.memref_squeeze %0 : memref<1x!tpu.dma_semaphore, #tpu.memory_space<semaphore_mem>> -> memref<!tpu.dma_semaphore, #tpu.memory_space<semaphore_mem>>
    tpu.enqueue_dma source(%arg8 : memref<640x256xf32, #tpu.memory_space<any>>) target(%arg15 : memref<640x256xf32, #tpu.memory_space<vmem>>) target_semaphore(%1 : memref<!tpu.dma_semaphore, #tpu.memory_space<semaphore_mem>>)
    %c1_i32 = arith.constant 1 : i32
    %2 = tpu.memref_slice %arg17[%c1_i32] : memref<2x!tpu.dma_semaphore, #tpu.memory_space<semaphore_mem>> -> memref<1x!tpu.dma_semaphore, #tpu.memory_space<semaphore_mem>>
    %3 = tpu.memref_squeeze %2 : memref<1x!tpu.dma_semaphore, #tpu.memory_space<semaphore_mem>> -> memref<!tpu.dma_semaphore, #tpu.memory_space<semaphore_mem>>
    tpu.enqueue_dma source(%arg11 : memref<768x128xf32, #tpu.memory_space<any>>) target(%arg16 : memref<768x128xf32, #tpu.memory_space<vmem>>) target_semaphore(%3 : memref<!tpu.dma_semaphore, #tpu.memory_space<semaphore_mem>>)
    %c0 = arith.constant 0 : index
    %c0_0 = arith.constant 0 : index
    %4 = vector.load %arg2[%c0, %c0_0] : memref<16x128xf32, #tpu.memory_space<vmem>>, vector<16x128xf32>
    %c0_1 = arith.constant 0 : index
    %c0_2 = arith.constant 0 : index
    %5 = vector.load %arg3[%c0_1, %c0_2] : memref<32x128xf32, #tpu.memory_space<vmem>>, vector<32x128xf32>
    %c0_3 = arith.constant 0 : index
    %c0_4 = arith.constant 0 : index
    %6 = vector.load %arg4[%c0_3, %c0_4] : memref<1x128xf32, #tpu.memory_space<vmem>>, vector<1x128xf32>
    %c0_5 = arith.constant 0 : index
    %c0_6 = arith.constant 0 : index
    %7 = vector.load %arg0[%c0_5, %c0_6] : memref<32x16xf32, #tpu.memory_space<vmem>>, vector<32x16xf32>
    %cst = arith.constant dense<0.000000e+00> : vector<32x128xf32>
    %8 = tpu.matmul %7, %4, %cst {dimension_numbers = #tpu.dot_dimension_numbers<[1], [0], [0], [1], [0, 0, 1, 1], [], []>} : vector<32x16xf32>, vector<16x128xf32>, vector<32x128xf32> -> vector<32x128xf32>
    %9 = vector.broadcast %6 : vector<1x128xf32> to vector<32x128xf32>
    %10 = arith.addf %8, %9 : vector<32x128xf32>
    %cst_7 = arith.constant 0.000000e+00 : f32
    %11 = vector.broadcast %cst_7 : f32 to vector<8x32xf32>
    %cst_8 = arith.constant 0.000000e+00 : f32
    %12 = vector.broadcast %cst_8 : f32 to vector<8x32xf32>
    %13 = vector.extract_strided_slice %10 {offsets = [0, 0], sizes = [8, 128], strides = [1, 1]} : vector<32x128xf32> to vector<8x128xf32>
    %cst_9 = arith.constant dense<0.000000e+00> : vector<8x128xf32>
    %14 = tpu.matmul %11, %5, %cst_9 {dimension_numbers = #tpu.dot_dimension_numbers<[1], [0], [0], [1], [0, 0, 1, 1], [], []>} : vector<8x32xf32>, vector<32x128xf32>, vector<8x128xf32> -> vector<8x128xf32>
    %15 = arith.addf %13, %14 : vector<8x128xf32>
    %16 = vector.extract_strided_slice %15 {offsets = [0, 0], sizes = [8, 96], strides = [1, 1]} : vector<8x128xf32> to vector<8x96xf32>
    %17 = arith.negf %16 : vector<8x96xf32>
    %18 = math.exp %17 : vector<8x96xf32>
    %cst_10 = arith.constant 1.000000e+00 : f32
    %19 = vector.broadcast %cst_10 : f32 to vector<8x96xf32>
    %20 = arith.addf %19, %18 : vector<8x96xf32>
    %21 = arith.divf %19, %20 : vector<8x96xf32>
    %22 = vector.extract_strided_slice %15 {offsets = [0, 96], sizes = [8, 32], strides = [1, 1]} : vector<8x128xf32> to vector<8x32xf32>
    %23 = math.tanh %22 : vector<8x32xf32>
    %24 = vector.extract_strided_slice %21 {offsets = [0, 0], sizes = [8, 32], strides = [1, 1]} : vector<8x96xf32> to vector<8x32xf32>
    %25 = vector.extract_strided_slice %21 {offsets = [0, 32], sizes = [8, 32], strides = [1, 1]} : vector<8x96xf32> to vector<8x32xf32>
    %26 = vector.extract_strided_slice %21 {offsets = [0, 64], sizes = [8, 32], strides = [1, 1]} : vector<8x96xf32> to vector<8x32xf32>
    %27 = arith.mulf %25, %12 : vector<8x32xf32>
    %28 = arith.mulf %24, %23 : vector<8x32xf32>
    %29 = arith.addf %27, %28 : vector<8x32xf32>
    %30 = math.tanh %29 : vector<8x32xf32>
    %31 = arith.mulf %26, %30 : vector<8x32xf32>
    %32 = vector.extract_strided_slice %10 {offsets = [8, 0], sizes = [8, 128], strides = [1, 1]} : vector<32x128xf32> to vector<8x128xf32>
    %cst_11 = arith.constant dense<0.000000e+00> : vector<8x128xf32>
    %33 = tpu.matmul %31, %5, %cst_11 {dimension_numbers = #tpu.dot_dimension_numbers<[1], [0], [0], [1], [0, 0, 1, 1], [], []>} : vector<8x32xf32>, vector<32x128xf32>, vector<8x128xf32> -> vector<8x128xf32>
    %34 = arith.addf %32, %33 : vector<8x128xf32>
    %35 = vector.extract_strided_slice %34 {offsets = [0, 0], sizes = [8, 96], strides = [1, 1]} : vector<8x128xf32> to vector<8x96xf32>
    %36 = arith.negf %35 : vector<8x96xf32>
    %37 = math.exp %36 : vector<8x96xf32>
    %cst_12 = arith.constant 1.000000e+00 : f32
    %38 = vector.broadcast %cst_12 : f32 to vector<8x96xf32>
    %39 = arith.addf %38, %37 : vector<8x96xf32>
    %40 = arith.divf %38, %39 : vector<8x96xf32>
    %41 = vector.extract_strided_slice %34 {offsets = [0, 96], sizes = [8, 32], strides = [1, 1]} : vector<8x128xf32> to vector<8x32xf32>
    %42 = math.tanh %41 : vector<8x32xf32>
    %43 = vector.extract_strided_slice %40 {offsets = [0, 0], sizes = [8, 32], strides = [1, 1]} : vector<8x96xf32> to vector<8x32xf32>
    %44 = vector.extract_strided_slice %40 {offsets = [0, 32], sizes = [8, 32], strides = [1, 1]} : vector<8x96xf32> to vector<8x32xf32>
    %45 = vector.extract_strided_slice %40 {offsets = [0, 64], sizes = [8, 32], strides = [1, 1]} : vector<8x96xf32> to vector<8x32xf32>
    %46 = arith.mulf %44, %29 : vector<8x32xf32>
    %47 = arith.mulf %43, %42 : vector<8x32xf32>
    %48 = arith.addf %46, %47 : vector<8x32xf32>
    %49 = math.tanh %48 : vector<8x32xf32>
    %50 = arith.mulf %45, %49 : vector<8x32xf32>
    %51 = vector.extract_strided_slice %10 {offsets = [16, 0], sizes = [8, 128], strides = [1, 1]} : vector<32x128xf32> to vector<8x128xf32>
    %cst_13 = arith.constant dense<0.000000e+00> : vector<8x128xf32>
    %52 = tpu.matmul %50, %5, %cst_13 {dimension_numbers = #tpu.dot_dimension_numbers<[1], [0], [0], [1], [0, 0, 1, 1], [], []>} : vector<8x32xf32>, vector<32x128xf32>, vector<8x128xf32> -> vector<8x128xf32>
    %53 = arith.addf %51, %52 : vector<8x128xf32>
    %54 = vector.extract_strided_slice %53 {offsets = [0, 0], sizes = [8, 96], strides = [1, 1]} : vector<8x128xf32> to vector<8x96xf32>
    %55 = arith.negf %54 : vector<8x96xf32>
    %56 = math.exp %55 : vector<8x96xf32>
    %cst_14 = arith.constant 1.000000e+00 : f32
    %57 = vector.broadcast %cst_14 : f32 to vector<8x96xf32>
    %58 = arith.addf %57, %56 : vector<8x96xf32>
    %59 = arith.divf %57, %58 : vector<8x96xf32>
    %60 = vector.extract_strided_slice %53 {offsets = [0, 96], sizes = [8, 32], strides = [1, 1]} : vector<8x128xf32> to vector<8x32xf32>
    %61 = math.tanh %60 : vector<8x32xf32>
    %62 = vector.extract_strided_slice %59 {offsets = [0, 0], sizes = [8, 32], strides = [1, 1]} : vector<8x96xf32> to vector<8x32xf32>
    %63 = vector.extract_strided_slice %59 {offsets = [0, 32], sizes = [8, 32], strides = [1, 1]} : vector<8x96xf32> to vector<8x32xf32>
    %64 = vector.extract_strided_slice %59 {offsets = [0, 64], sizes = [8, 32], strides = [1, 1]} : vector<8x96xf32> to vector<8x32xf32>
    %65 = arith.mulf %63, %48 : vector<8x32xf32>
    %66 = arith.mulf %62, %61 : vector<8x32xf32>
    %67 = arith.addf %65, %66 : vector<8x32xf32>
    %68 = math.tanh %67 : vector<8x32xf32>
    %69 = arith.mulf %64, %68 : vector<8x32xf32>
    %70 = vector.extract_strided_slice %10 {offsets = [24, 0], sizes = [8, 128], strides = [1, 1]} : vector<32x128xf32> to vector<8x128xf32>
    %cst_15 = arith.constant dense<0.000000e+00> : vector<8x128xf32>
    %71 = tpu.matmul %69, %5, %cst_15 {dimension_numbers = #tpu.dot_dimension_numbers<[1], [0], [0], [1], [0, 0, 1, 1], [], []>} : vector<8x32xf32>, vector<32x128xf32>, vector<8x128xf32> -> vector<8x128xf32>
    %72 = arith.addf %70, %71 : vector<8x128xf32>
    %73 = vector.extract_strided_slice %72 {offsets = [0, 0], sizes = [8, 96], strides = [1, 1]} : vector<8x128xf32> to vector<8x96xf32>
    %74 = arith.negf %73 : vector<8x96xf32>
    %75 = math.exp %74 : vector<8x96xf32>
    %cst_16 = arith.constant 1.000000e+00 : f32
    %76 = vector.broadcast %cst_16 : f32 to vector<8x96xf32>
    %77 = arith.addf %76, %75 : vector<8x96xf32>
    %78 = arith.divf %76, %77 : vector<8x96xf32>
    %79 = vector.extract_strided_slice %72 {offsets = [0, 96], sizes = [8, 32], strides = [1, 1]} : vector<8x128xf32> to vector<8x32xf32>
    %80 = math.tanh %79 : vector<8x32xf32>
    %81 = vector.extract_strided_slice %78 {offsets = [0, 0], sizes = [8, 32], strides = [1, 1]} : vector<8x96xf32> to vector<8x32xf32>
    %82 = vector.extract_strided_slice %78 {offsets = [0, 32], sizes = [8, 32], strides = [1, 1]} : vector<8x96xf32> to vector<8x32xf32>
    %83 = vector.extract_strided_slice %78 {offsets = [0, 64], sizes = [8, 32], strides = [1, 1]} : vector<8x96xf32> to vector<8x32xf32>
    %84 = arith.mulf %82, %67 : vector<8x32xf32>
    %85 = arith.mulf %81, %80 : vector<8x32xf32>
    %86 = arith.addf %84, %85 : vector<8x32xf32>
    %87 = math.tanh %86 : vector<8x32xf32>
    %88 = arith.mulf %83, %87 : vector<8x32xf32>
    %c0_17 = arith.constant 0 : index
    %c0_18 = arith.constant 0 : index
    %89 = vector.load %arg1[%c0_17, %c0_18] : memref<20x32xf32, #tpu.memory_space<vmem>>, vector<20x32xf32>
    %c0_19 = arith.constant 0 : index
    %c0_20 = arith.constant 0 : index
    %90 = vector.load %arg5[%c0_19, %c0_20] : memref<32x128xf32, #tpu.memory_space<vmem>>, vector<32x128xf32>
    %cst_21 = arith.constant dense<0.000000e+00> : vector<20x128xf32>
    %91 = tpu.matmul %89, %90, %cst_21 {dimension_numbers = #tpu.dot_dimension_numbers<[1], [0], [0], [1], [0, 0, 1, 1], [], []>} : vector<20x32xf32>, vector<32x128xf32>, vector<20x128xf32> -> vector<20x128xf32>
    %c0_22 = arith.constant 0 : index
    %c0_23 = arith.constant 0 : index
    %92 = vector.load %arg6[%c0_22, %c0_23] : memref<1x128xf32, #tpu.memory_space<vmem>>, vector<1x128xf32>
    %93 = vector.broadcast %92 : vector<1x128xf32> to vector<20x128xf32>
    %94 = arith.mulf %91, %93 : vector<20x128xf32>
    %c0_24 = arith.constant 0 : index
    %c0_25 = arith.constant 0 : index
    %95 = vector.load %arg7[%c0_24, %c0_25] : memref<1x128xf32, #tpu.memory_space<vmem>>, vector<1x128xf32>
    %96 = vector.broadcast %95 : vector<1x128xf32> to vector<20x128xf32>
    %97 = arith.addf %94, %96 : vector<20x128xf32>
    %cst_26 = arith.constant 0.000000e+00 : f32
    %98 = vector.broadcast %cst_26 : f32 to vector<20x128xf32>
    %99 = arith.maximumf %97, %98 : vector<20x128xf32>
    %c0_i32_27 = arith.constant 0 : i32
    %100 = tpu.memref_slice %arg17[%c0_i32_27] : memref<2x!tpu.dma_semaphore, #tpu.memory_space<semaphore_mem>> -> memref<1x!tpu.dma_semaphore, #tpu.memory_space<semaphore_mem>>
    %101 = tpu.memref_squeeze %100 : memref<1x!tpu.dma_semaphore, #tpu.memory_space<semaphore_mem>> -> memref<!tpu.dma_semaphore, #tpu.memory_space<semaphore_mem>>
    tpu.wait_dma2 semaphore(%101 : memref<!tpu.dma_semaphore, #tpu.memory_space<semaphore_mem>>) src(%arg8 : memref<640x256xf32, #tpu.memory_space<any>>) dst(%arg15 : memref<640x256xf32, #tpu.memory_space<vmem>>)
    %102 = vector.extract_strided_slice %99 {offsets = [0, 0], sizes = [6, 128], strides = [1, 1]} : vector<20x128xf32> to vector<6x128xf32>
    %103 = vector.extract_strided_slice %99 {offsets = [10, 0], sizes = [6, 128], strides = [1, 1]} : vector<20x128xf32> to vector<6x128xf32>
    %104 = tpu.concatenate %102, %103 in 0 : vector<6x128xf32>, vector<6x128xf32> -> vector<12x128xf32>
    %105 = vector.extract_strided_slice %99 {offsets = [1, 0], sizes = [6, 128], strides = [1, 1]} : vector<20x128xf32> to vector<6x128xf32>
    %106 = vector.extract_strided_slice %99 {offsets = [11, 0], sizes = [6, 128], strides = [1, 1]} : vector<20x128xf32> to vector<6x128xf32>
    %107 = tpu.concatenate %105, %106 in 0 : vector<6x128xf32>, vector<6x128xf32> -> vector<12x128xf32>
    %108 = vector.extract_strided_slice %99 {offsets = [2, 0], sizes = [6, 128], strides = [1, 1]} : vector<20x128xf32> to vector<6x128xf32>
    %109 = vector.extract_strided_slice %99 {offsets = [12, 0], sizes = [6, 128], strides = [1, 1]} : vector<20x128xf32> to vector<6x128xf32>
    %110 = tpu.concatenate %108, %109 in 0 : vector<6x128xf32>, vector<6x128xf32> -> vector<12x128xf32>
    %111 = vector.extract_strided_slice %99 {offsets = [3, 0], sizes = [6, 128], strides = [1, 1]} : vector<20x128xf32> to vector<6x128xf32>
    %112 = vector.extract_strided_slice %99 {offsets = [13, 0], sizes = [6, 128], strides = [1, 1]} : vector<20x128xf32> to vector<6x128xf32>
    %113 = tpu.concatenate %111, %112 in 0 : vector<6x128xf32>, vector<6x128xf32> -> vector<12x128xf32>
    %114 = vector.extract_strided_slice %99 {offsets = [4, 0], sizes = [6, 128], strides = [1, 1]} : vector<20x128xf32> to vector<6x128xf32>
    %115 = vector.extract_strided_slice %99 {offsets = [14, 0], sizes = [6, 128], strides = [1, 1]} : vector<20x128xf32> to vector<6x128xf32>
    %116 = tpu.concatenate %114, %115 in 0 : vector<6x128xf32>, vector<6x128xf32> -> vector<12x128xf32>
    %117 = tpu.concatenate %104, %107, %110, %113, %116 in 1 : vector<12x128xf32>, vector<12x128xf32>, vector<12x128xf32>, vector<12x128xf32>, vector<12x128xf32> -> vector<12x640xf32>
    %c0_28 = arith.constant 0 : index
    %c0_29 = arith.constant 0 : index
    %118 = vector.load %arg15[%c0_28, %c0_29] : memref<640x256xf32, #tpu.memory_space<vmem>>, vector<640x256xf32>
    %cst_30 = arith.constant dense<0.000000e+00> : vector<12x256xf32>
    %119 = tpu.matmul %117, %118, %cst_30 {dimension_numbers = #tpu.dot_dimension_numbers<[1], [0], [0], [1], [0, 0, 1, 1], [], []>} : vector<12x640xf32>, vector<640x256xf32>, vector<12x256xf32> -> vector<12x256xf32>
    %c0_31 = arith.constant 0 : index
    %c0_32 = arith.constant 0 : index
    %120 = vector.load %arg9[%c0_31, %c0_32] : memref<1x256xf32, #tpu.memory_space<vmem>>, vector<1x256xf32>
    %121 = vector.broadcast %120 : vector<1x256xf32> to vector<12x256xf32>
    %122 = arith.mulf %119, %121 : vector<12x256xf32>
    %c0_33 = arith.constant 0 : index
    %c0_34 = arith.constant 0 : index
    %123 = vector.load %arg10[%c0_33, %c0_34] : memref<1x256xf32, #tpu.memory_space<vmem>>, vector<1x256xf32>
    %124 = vector.broadcast %123 : vector<1x256xf32> to vector<12x256xf32>
    %125 = arith.addf %122, %124 : vector<12x256xf32>
    %cst_35 = arith.constant 0.000000e+00 : f32
    %126 = vector.broadcast %cst_35 : f32 to vector<12x256xf32>
    %127 = arith.maximumf %125, %126 : vector<12x256xf32>
    %c1_i32_36 = arith.constant 1 : i32
    %128 = tpu.memref_slice %arg17[%c1_i32_36] : memref<2x!tpu.dma_semaphore, #tpu.memory_space<semaphore_mem>> -> memref<1x!tpu.dma_semaphore, #tpu.memory_space<semaphore_mem>>
    %129 = tpu.memref_squeeze %128 : memref<1x!tpu.dma_semaphore, #tpu.memory_space<semaphore_mem>> -> memref<!tpu.dma_semaphore, #tpu.memory_space<semaphore_mem>>
    tpu.wait_dma2 semaphore(%129 : memref<!tpu.dma_semaphore, #tpu.memory_space<semaphore_mem>>) src(%arg11 : memref<768x128xf32, #tpu.memory_space<any>>) dst(%arg16 : memref<768x128xf32, #tpu.memory_space<vmem>>)
    %130 = vector.extract_strided_slice %127 {offsets = [0, 0], sizes = [4, 256], strides = [1, 1]} : vector<12x256xf32> to vector<4x256xf32>
    %131 = vector.extract_strided_slice %127 {offsets = [6, 0], sizes = [4, 256], strides = [1, 1]} : vector<12x256xf32> to vector<4x256xf32>
    %132 = tpu.concatenate %130, %131 in 0 : vector<4x256xf32>, vector<4x256xf32> -> vector<8x256xf32>
    %133 = vector.extract_strided_slice %127 {offsets = [1, 0], sizes = [4, 256], strides = [1, 1]} : vector<12x256xf32> to vector<4x256xf32>
    %134 = vector.extract_strided_slice %127 {offsets = [7, 0], sizes = [4, 256], strides = [1, 1]} : vector<12x256xf32> to vector<4x256xf32>
    %135 = tpu.concatenate %133, %134 in 0 : vector<4x256xf32>, vector<4x256xf32> -> vector<8x256xf32>
    %136 = vector.extract_strided_slice %127 {offsets = [2, 0], sizes = [4, 256], strides = [1, 1]} : vector<12x256xf32> to vector<4x256xf32>
    %137 = vector.extract_strided_slice %127 {offsets = [8, 0], sizes = [4, 256], strides = [1, 1]} : vector<12x256xf32> to vector<4x256xf32>
    %138 = tpu.concatenate %136, %137 in 0 : vector<4x256xf32>, vector<4x256xf32> -> vector<8x256xf32>
    %139 = tpu.concatenate %132, %135, %138 in 1 : vector<8x256xf32>, vector<8x256xf32>, vector<8x256xf32> -> vector<8x768xf32>
    %c0_37 = arith.constant 0 : index
    %c0_38 = arith.constant 0 : index
    %140 = vector.load %arg16[%c0_37, %c0_38] : memref<768x128xf32, #tpu.memory_space<vmem>>, vector<768x128xf32>
    %cst_39 = arith.constant dense<0.000000e+00> : vector<8x128xf32>
    %141 = tpu.matmul %139, %140, %cst_39 {dimension_numbers = #tpu.dot_dimension_numbers<[1], [0], [0], [1], [0, 0, 1, 1], [], []>} : vector<8x768xf32>, vector<768x128xf32>, vector<8x128xf32> -> vector<8x128xf32>
    %c0_40 = arith.constant 0 : index
    %c0_41 = arith.constant 0 : index
    %142 = vector.load %arg12[%c0_40, %c0_41] : memref<1x128xf32, #tpu.memory_space<vmem>>, vector<1x128xf32>
    %143 = vector.broadcast %142 : vector<1x128xf32> to vector<8x128xf32>
    %144 = arith.mulf %141, %143 : vector<8x128xf32>
    %c0_42 = arith.constant 0 : index
    %c0_43 = arith.constant 0 : index
    %145 = vector.load %arg13[%c0_42, %c0_43] : memref<1x128xf32, #tpu.memory_space<vmem>>, vector<1x128xf32>
    %146 = vector.broadcast %145 : vector<1x128xf32> to vector<8x128xf32>
    %147 = arith.addf %144, %146 : vector<8x128xf32>
    %cst_44 = arith.constant 0.000000e+00 : f32
    %148 = vector.broadcast %cst_44 : f32 to vector<8x128xf32>
    %149 = arith.maximumf %147, %148 : vector<8x128xf32>
    %150 = vector.extract_strided_slice %149 {offsets = [0, 0], sizes = [4, 128], strides = [1, 1]} : vector<8x128xf32> to vector<4x128xf32>
    %cst_45 = arith.constant dense<0.000000e+00> : vector<128xf32>
    %151 = vector.multi_reduction <add>, %150, %cst_45 [0] : vector<4x128xf32> to vector<128xf32>
    %152 = vector.shape_cast %151 : vector<128xf32> to vector<1x128xf32>
    %cst_46 = arith.constant 4.000000e+00 : f32
    %153 = vector.broadcast %cst_46 : f32 to vector<1x128xf32>
    %154 = arith.divf %152, %153 : vector<1x128xf32>
    %155 = vector.extract_strided_slice %149 {offsets = [4, 0], sizes = [4, 128], strides = [1, 1]} : vector<8x128xf32> to vector<4x128xf32>
    %cst_47 = arith.constant dense<0.000000e+00> : vector<128xf32>
    %156 = vector.multi_reduction <add>, %155, %cst_47 [0] : vector<4x128xf32> to vector<128xf32>
    %157 = vector.shape_cast %156 : vector<128xf32> to vector<1x128xf32>
    %cst_48 = arith.constant 4.000000e+00 : f32
    %158 = vector.broadcast %cst_48 : f32 to vector<1x128xf32>
    %159 = arith.divf %157, %158 : vector<1x128xf32>
    %160 = tpu.concatenate %154, %159 in 0 : vector<1x128xf32>, vector<1x128xf32> -> vector<2x128xf32>
    %161 = vector.extract_strided_slice %88 {offsets = [0, 0], sizes = [2, 32], strides = [1, 1]} : vector<8x32xf32> to vector<2x32xf32>
    %c0_49 = arith.constant 0 : index
    %c0_50 = arith.constant 0 : index
    %162 = vector.load %arg14[%c0_49, %c0_50] : memref<2x160xf32, #tpu.memory_space<vmem>>, vector<2x32xf32>
    tpu.vector_store %arg14[%c0_49, %c0_50], %161 {strides = array<i32>} : memref<2x160xf32, #tpu.memory_space<vmem>>, vector<2x32xf32>,
    %c0_51 = arith.constant 0 : index
    %c32 = arith.constant 32 : index
    %163 = vector.load %arg14[%c0_51, %c32] : memref<2x160xf32, #tpu.memory_space<vmem>>, vector<2x128xf32>
    tpu.vector_store %arg14[%c0_51, %c32], %160 {strides = array<i32>} : memref<2x160xf32, #tpu.memory_space<vmem>>, vector<2x128xf32>,
    return
  }
}

</mosaic_0001>

<bundles_post_ra>
// kernel: rnn_fcn_backbone_forward.1
= control target key start
LH: loop header
LB: loop body
LE: loop exit
PB: predicated region body
PF: predicated region fallthrough
CT: control target
= control target key end

     0   :  { %vm84_vm0 = vcmask 130048   ;;  %v2254_v3 = vmov 0.0|0.0   ;;  %vm2255_vm1 = vmmov 0   ;;  %v2256_v10 = vmov 0.0   ;;  %s2604_s0 = inlined_call_operand.vmem [shape: f32[32,16], index: 0, kind: input, shape index: {}]   ;;  %s2605_s1 = inlined_call_operand.vmem [shape: f32[20,32], index: 1, kind: input, shape index: {}]   ;;  %s2606_s2 = inlined_call_operand.vmem [shape: f32[16,128], index: 2, kind: input, shape index: {}]   ;;  %s2607_s3 = inlined_call_operand.vmem [shape: f32[32,128], index: 3, kind: input, shape index: {}]   ;;  %s2608_s4 = inlined_call_operand.vmem [shape: f32[1,128], index: 4, kind: input, shape index: {}]   ;;  %s2609_s5 = inlined_call_operand.vmem [shape: f32[32,128], index: 5, kind: input, shape index: {}]   ;;  %s2610_s6 = inlined_call_operand.vmem [shape: f32[1,128], index: 6, kind: input, shape index: {}]   ;;  %s2611_s7 = inlined_call_operand.vmem [shape: f32[1,128], index: 7, kind: input, shape index: {}]   ;;  %s2612_s8 = inlined_call_operand.hbm [shape: f32[640,256], index: 8, kind: input, shape index: {}]   ;;  %s2613_s9 = inlined_call_operand.vmem [shape: f32[1,256], index: 9, kind: input, shape index: {}]   ;;  %s2614_s10 = inlined_call_operand.vmem [shape: f32[1,256], index: 10, kind: input, shape index: {}]   ;;  %s2615_s11 = inlined_call_operand.hbm [shape: f32[768,128], index: 11, kind: input, shape index: {}]   ;;  %s2616_s12 = inlined_call_operand.vmem [shape: f32[1,128], index: 12, kind: input, shape index: {}]   ;;  %s2617_s13 = inlined_call_operand.vmem [shape: f32[1,128], index: 13, kind: input, shape index: {}]   ;;  %s2618_s14 = inlined_call_operand.hbm [shape: f32[2,160], index: 14, kind: output, shape index: {}]  }
   0x1   :  { %v67_v0 = vld [vmem:[%s2606_s2] sm:$0xff]  ;;  %v68_v1 = vld [vmem:[%s2606_s2 + $0x8] sm:$0xff]  ;;  %1847 = vmatprep.subr.bf16.mxu1 %v2254_v3  ;;  %v71_v8 = vld [vmem:[%s2607_s3 + $0x10] sm:$0xff]  ;;  %1790 = vmatprep.mubr.msk.f32.mxu1 %vm2255_vm1, %v2256_v10 }
   0x2   :  { %v69_v2 = vld [vmem:[%s2607_s3] sm:$0xff]  ;;  %v1843_v4 = vpack.c.bf16 %v68_v1, %v67_v0  ;;  %v70_v5 = vld [vmem:[%s2607_s3 + $0x8] sm:$0xff]  ;;  %v72_v9 = vld [vmem:[%s2607_s3 + $0x18] sm:$0xff] }
   0x3   :  { %v74_v6 = vld [vmem:[%s2604_s0] sm:$0xff]  ;;  %v2354_v7 = vpack.c.bf16 %v70_v5, %v69_v2 }
   0x4   :  { %1776 = vmatprep.mubr.msk.f32.mxu0 %vm84_vm0, %v74_v6 }
   0x5   :  { %19 = vsyncpa [#allocation6], 0  ;;  %1844 = vmatprep.subr.bf16.mxu0 %v1843_v4  ;;  %1849 = vmatpush3.bf16.msra.mxu1 %v2354_v7  ;;  %v75_v11 = vld [vmem:[%s2604_s0 + $0x8] sm:$0xff]  ;;  %v1851_v12 = vpack.c.bf16 %v72_v9, %v71_v8  ;;  %v2385_v13 = vld [vmem:[%s2608_s4] ss:$0 sm:$0xff]  ;;  %s2257_s29 = smov 32  }
   0x6   :  { %1846 = vmatpush3.bf16.msra.mxu0 %v1843_v4  ;;  %1850 = vmatprep.subr.bf16.mxu1 %v2254_v3  ;;  %v76_v30 = vld [vmem:[%s2604_s0 + $0x10] sm:$0xff]  ;;  %v77_v31 = vld [vmem:[%s2604_s0 + $0x18] sm:$0xff]  ;;  %s2258_s17 = smov 64   ;;  %vm182_vm2 = vcmask 261120   ;;  %s2182_s19 = scalar_lea.hbm %s2612_s8, 20480 }
   0x7   :  { %1853 = vmatprep.subr.bf16.mxu0 %v2254_v3  ;;  %p2183_p0 = scmp.ne.s32.totalorder %s2612_s8, %s2182_s19  ;;  %p2186_p1 = scmp.lt.u32.totalorder %s2182_s19, %s2612_s8 }
   0x9   :  { %1777 = vmatmul.mubr.msk.f32.vlgmr.msra.gmra.mrb[0].mxu0 %vm84_vm0, %v75_v11  ;;  %1852 = vmatpush3.bf16.msra.mxu1 %v1851_v12  ;;  %p2188_p2 = pnand %p2186_p1, %p2183_p0 }
   0xa   :  { %1855 = vmatpush3.bf16.msra.mxu0 %v2354_v7  ;;  %1859 = vmatprep.subr.bf16.mxu1 %v2254_v3 }
   0xb   :  { %1856 = vmatprep.subr.bf16.mxu0 %v2254_v3  ;;  %1779 = vmatprep.mubr.msk.f32.mxu0 %vm84_vm0, %v76_v30 }
   0xc   :  { %1791 = vmatmul.mubr.f32.vlgmr.msra.gmra.mrb[0].mxu1 %v2256_v10 }
   0xd   :  { %1861 = vmatpush3.bf16.msra.mxu1 %v2354_v7  ;;  %1812 = vmatprep.mubr.msk.f32.mxu1 %vm2255_vm1, %v2256_v10 }
   0xe   :  { %1858 = vmatpush3.bf16.msra.mxu0 %v1851_v12  ;;  %1862 = vmatprep.subr.bf16.mxu1 %v2254_v3 }
   0xf   :  { %1865 = vmatprep.subr.bf16.mxu0 %v2254_v3  ;;  %1780 = vmatmul.mubr.msk.f32.gmra.mrb[2].mxu0 %vm84_vm0, %v77_v31  ;;  %v1628_v31 = vld [vmem:[%s2610_s6] ss:$0 sm:$0xff] }
  0x10   :  { %1801 = vmatprep.mubr.msk.f32.mxu0 %vm2255_vm1, %v2256_v10 }
  0x11   :  { %1864 = vmatpush3.bf16.msra.mxu1 %v1851_v12 }
  0x12   :  { %1871 = vmatprep.subr.bf16.mxu1 %v2254_v3 }
  0xdc   :  { %v1778_v14 = vpop.f32.mrb[0].mxu0 }
  0xdd   :  { %v163_v15 = vpop.f32.mrb[1].mxu0  ;;  %v169_v38 = vadd.f32 %v1778_v14, %v2385_v13 }
  0xde   :  { %v164_v16 = vadd.f32 %v2385_v13, %v163_v15 }
  0xdf   :  { %v252_v17 = vpop.f32.mrb[0].mxu1 }
  0xe0   :  { %v256_v18 = vadd.f32 %v252_v17, %v164_v16  ;;  %v1792_v19 = vpop.f32.mrb[1].mxu1  ;;  %v584_v17 = vld [vmem:[%s2609_s5] sm:$0xff] }
  0xe1   :  { %v586_v19 = vld [vmem:[%s2609_s5 + $0x10] sm:$0xff] }
  0xe2   :  { %2150 = vtanh.f32 %v256_v18  ;;  %v1618_v21 = vmul.f32 -1.442695, %v256_v18  ;;  %v2402_v35 = vpop.f32.mrb[2].mxu0  ;;  %v585_v18 = vld [vmem:[%s2609_s5 + $0x8] sm:$0xff] }
  0xe3   :  { %v173_v36 = vpop.f32.mrb[3].mxu0 }
  0xe4   :  { %2152 = vpow2.f32 %v1618_v21  ;;  %v174_v56 = vadd.f32 %v2385_v13, %v173_v36 }
  0xec   :  { %v2151_v20 = vpop.eup %2150 }
  0xed   :  { %266 = vrot.lane.b32.xlu0 %v2151_v20, %s2257_s29  ;;  %v1872_v20 = vpack.c.bf16 %v585_v18, %v584_v17 }
  0xee   :  { %v2153_v22 = vpop.eup %2152 }
  0xef   :  { %v260_v23 = vadd.f32 1.0, %v2153_v22  ;;  %v581_v22 = vld [vmem:[%s2605_s1] sm:$0xff] }
  0xf1   :  { %2154 = vrcp.f32 %v260_v23 }
  0xfb   :  { %v2155_v24 = vpop.eup %2154 }
  0xfc   :  { %v264_v27 = vmul.f32 0.0, %v2155_v24 }
 0x15f   :  { %v267_v25 = vpop.permute.xlu0 %266 }
 0x160   :  { %v269_v26 = vmul.f32 %v2155_v24, %v267_v25 }
 0x162   :  { %271 = vrot.lane.b32.xlu0 %v269_v26, %s2257_s29 }
 0x1d4   :  { %v272_v28 = vpop.permute.xlu0 %271 }
 0x1d5   :  { %v274_v29 = vadd.f32 %v272_v28, %v264_v27 }
 0x1d7   :  { %2156 = vtanh.f32 %v274_v29 }
 0x1e1   :  { %v2157_v32 = vpop.eup %2156 }
 0x1e2   :  { %277 = vrot.lane.b32.xlu1 %v2157_v32, %s2257_s29 }
 0x254   :  { %v278_v33 = vpop.permute.xlu1 %277 }
 0x255   :  { %v280_v34 = vmul.f32 %v2155_v24, %v278_v33  ;;  %v582_v24 = vld [vmem:[%s2605_s1 + $0x8] sm:$0xff]  ;;  %v1629_v33 = vld [vmem:[%s2611_s7] ss:$0 sm:$0xff]  ;;  %s2260_s7 = smov [#allocation3]  }
 0x256   :  { %s63_s16 = sshll.u32 %s2260_s7, 4  ;;  %s64_s16 = int_to_ptr.vmem [resolvable:$true] %s63_s16 }
 0x257   :  { %282 = vrot.lane.b32.xlu1 %v280_v34, %s2258_s17 }
 0x2c9   :  { %v283_v37 = vpop.permute.xlu1 %282 }
 0x2ca   :  { %1802 = vmatmul.mubr.msk.f32.vlgmr.msra.gmra.mrb[4].mxu0 %vm182_vm2, %v283_v37 }
 0x2cb   :  { %1867 = vmatpush3.bf16.msra.mxu0 %v2354_v7  ;;  %1823 = vmatprep.mubr.msk.f32.mxu0 %vm2255_vm1, %v2256_v10 }
 0x2cc   :  { %1868 = vmatprep.subr.bf16.mxu0 %v2254_v3 }
 0x2cf   :  { %1870 = vmatpush3.bf16.msra.mxu0 %v1851_v12  ;;  %v179_v12 = vadd.f32 %v2402_v35, %v2385_v13  ;;  %v587_v13 = vld [vmem:[%s2609_s5 + $0x18] sm:$0xff] }
 0x2d0   :  { %v1875_v21 = vpack.c.bf16 %v587_v13, %v586_v19 }
 0x39d   :  { %v352_v39 = vpop.f32.mrb[4].mxu0 }
 0x39e   :  { %v356_v40 = vadd.f32 %v352_v39, %v169_v38  ;;  %v1803_v41 = vpop.f32.mrb[5].mxu0 }
 0x3a0   :  { %2158 = vtanh.f32 %v356_v40  ;;  %v1620_v43 = vmul.f32 -1.442695, %v356_v40 }
 0x3a2   :  { %2160 = vpow2.f32 %v1620_v43 }
 0x3aa   :  { %v2159_v42 = vpop.eup %2158 }
 0x3ab   :  { %366 = vrot.lane.b32.xlu0 %v2159_v42, %s2257_s29 }
 0x3ac   :  { %v2161_v44 = vpop.eup %2160 }
 0x3ad   :  { %v360_v45 = vadd.f32 1.0, %v2161_v44 }
 0x3af   :  { %2162 = vrcp.f32 %v360_v45 }
 0x3b9   :  { %v2163_v46 = vpop.eup %2162 }
 0x3ba   :  { %v364_v49 = vmul.f32 %v2163_v46, %v274_v29 }
 0x41d   :  { %v367_v47 = vpop.permute.xlu0 %366 }
 0x41e   :  { %v369_v48 = vmul.f32 %v2163_v46, %v367_v47 }
 0x420   :  { %371 = vrot.lane.b32.xlu1 %v369_v48, %s2257_s29 }
 0x492   :  { %v372_v50 = vpop.permute.xlu1 %371 }
 0x493   :  { %v374_v51 = vadd.f32 %v372_v50, %v364_v49 }
 0x495   :  { %2164 = vtanh.f32 %v374_v51 }
 0x49f   :  { %v2165_v52 = vpop.eup %2164 }
 0x4a0   :  { %377 = vrot.lane.b32.xlu0 %v2165_v52, %s2257_s29 }
 0x512   :  { %v378_v53 = vpop.permute.xlu0 %377 }
 0x513   :  { %v380_v54 = vmul.f32 %v2163_v46, %v378_v53 }
 0x515   :  { %382 = vrot.lane.b32.xlu1 %v380_v54, %s2258_s17 }
 0x587   :  { %v383_v55 = vpop.permute.xlu1 %382 }
 0x588   :  { %1813 = vmatmul.mubr.msk.f32.vlgmr.msra.gmra.mrb[2].mxu1 %vm182_vm2, %v383_v55 }
 0x589   :  { %1834 = vmatprep.mubr.msk.f32.mxu1 %vm2255_vm1, %v2256_v10  ;;  %1873 = vmatpush3.bf16.msra.mxu1 %v1872_v20 }
 0x58a   :  { %1874 = vmatprep.subr.bf16.mxu1 %v2254_v3  ;;  %v583_v3 = vld [vmem:[%s2605_s1 + $0x10] sm:$0xf]  ;;  %s2259_s1 = smov [#allocation2]  }
 0x58b   :  { %s51_s6 = sshll.u32 %s2259_s1, 4  ;;  %s52_s6 = int_to_ptr.vmem [resolvable:$true] %s51_s6 }
 0x58d   :  { %1876 = vmatpush3.bf16.msra.mxu1 %v1875_v21 }
 0x590   :  { %1835 = vmatmul.mubr.msk.f32.vlgmr.msra.gmra.mrb[4].mxu1 %vm182_vm2, %v581_v22 }
 0x591   :  { %1837 = vmatprep.mubr.msk.f32.mxu1 %vm2255_vm1, %v2256_v10 }
 0x594   :  { %1838 = vmatmul.mubr.msk.f32.gmra.mrb[6].mxu1 %vm182_vm2, %v582_v24 }
 0x595   :  { %1840 = vmatprep.mubr.msk.f32.mxu1 %vm2255_vm1, %v2256_v10 }
 0x598   :  { %1841 = vmatmul.mubr.msk.f32.gmra.mrb[8].mxu1 %vm182_vm2, %v583_v3 }
 0x65b   :  { %v452_v57 = vpop.f32.mrb[2].mxu1 }
 0x65c   :  { %v456_v58 = vadd.f32 %v452_v57, %v174_v56  ;;  %v1814_v59 = vpop.f32.mrb[3].mxu1 }
 0x65e   :  { %2166 = vtanh.f32 %v456_v58  ;;  %v1622_v61 = vmul.f32 -1.442695, %v456_v58 }
 0x660   :  { %2168 = vpow2.f32 %v1622_v61 }
 0x663   :  { %v663_v32 = vpop.f32.mrb[4].mxu1 }
 0x664   :  { %v684_v34 = vmul.f32 %v1628_v31, %v663_v32  ;;  %v1836_v35 = vpop.f32.mrb[5].mxu1 }
 0x666   :  { %v694_v36 = vadd.f32 %v1629_v33, %v684_v34 }
 0x667   :  { %v668_v37 = vpop.f32.mrb[6].mxu1 }
 0x668   :  { %v2167_v60 = vpop.eup %2166  ;;  %v2462_v38 = vmax.f32 %v694_v36, 0.0  ;;  %v685_v39 = vmul.f32 %v1628_v31, %v668_v37  ;;  %v1839_v40 = vpop.f32.mrb[7].mxu1 }
 0x669   :  { %466 = vrot.lane.b32.xlu0 %v2167_v60, %s2257_s29 }
 0x66a   :  { %v2169_v62 = vpop.eup %2168  ;;  %v695_v41 = vadd.f32 %v1629_v33, %v685_v39 }
 0x66b   :  { %v460_v63 = vadd.f32 1.0, %v2169_v62  ;;  %v673_v42 = vpop.f32.mrb[8].mxu1 }
 0x66c   :  { %v2464_v43 = vmax.f32 %v695_v41, 0.0  ;;  %v686_v44 = vmul.f32 %v1628_v31, %v673_v42  ;;  %v1842_v45 = vpop.f32.mrb[9].mxu1 }
 0x66d   :  { %2170 = vrcp.f32 %v460_v63 }
 0x66e   :  { %v696_v46 = vadd.f32 %v1629_v33, %v686_v44 }
 0x670   :  { %v2466_v47 = vmax.f32 %v696_v46, 0.0 }
 0x677   :  { %v2171_v0 = vpop.eup %2170 }
 0x678   :  { %v464_v4 = vmul.f32 %v2171_v0, %v374_v51 }
 0x6db   :  { %v467_v1 = vpop.permute.xlu0 %466 }
 0x6dc   :  { %v469_v2 = vmul.f32 %v2171_v0, %v467_v1 }
 0x6de   :  { %471 = vrot.lane.b32.xlu1 %v469_v2, %s2257_s29 }
 0x750   :  { %v472_v5 = vpop.permute.xlu1 %471 }
 0x751   :  { %v474_v6 = vadd.f32 %v472_v5, %v464_v4 }
 0x753   :  { %2172 = vtanh.f32 %v474_v6 }
 0x75d   :  { %v2173_v7 = vpop.eup %2172 }
 0x75e   :  { %477 = vrot.lane.b32.xlu0 %v2173_v7, %s2257_s29 }
 0x7d0   :  { %v478_v8 = vpop.permute.xlu0 %477 }
 0x7d1   :  { %v480_v9 = vmul.f32 %v2171_v0, %v478_v8 }
 0x7d3   :  { %482 = vrot.lane.b32.xlu1 %v480_v9, %s2258_s17 }
 0x845   :  { %v483_v11 = vpop.permute.xlu1 %482 }
 0x846   :  { %1824 = vmatmul.mubr.msk.f32.vlgmr.msra.gmra.mrb[6].mxu0 %vm182_vm2, %v483_v11 }
 0x919   :  { %v552_v14 = vpop.f32.mrb[6].mxu0 }
 0x91a   :  { %v556_v15 = vadd.f32 %v552_v14, %v179_v12  ;;  %v1825_v16 = vpop.f32.mrb[7].mxu0 }
 0x91c   :  { %2174 = vtanh.f32 %v556_v15  ;;  %v1624_v25 = vmul.f32 -1.442695, %v556_v15 }
 0x91e   :  { %2176 = vpow2.f32 %v1624_v25 }
 0x926   :  { %v2175_v23 = vpop.eup %2174 }
 0x927   :  { %566 = vrot.lane.b32.xlu0 %v2175_v23, %s2257_s29 }
 0x928   :  { %v2177_v26 = vpop.eup %2176 }
 0x929   :  { %v560_v27 = vadd.f32 1.0, %v2177_v26 }
 0x92b   :  { %2178 = vrcp.f32 %v560_v27 }
 0x935   :  { %v2179_v28 = vpop.eup %2178 }
 0x936   :  { %v564_v48 = vmul.f32 %v2179_v28, %v474_v6 }
 0x999   :  { %v567_v29 = vpop.permute.xlu0 %566 }
 0x99a   :  { %v569_v30 = vmul.f32 %v2179_v28, %v567_v29 }
 0x99c   :  { %571 = vrot.lane.b32.xlu1 %v569_v30, %s2257_s29 }
 0xa0e   :  { %v572_v49 = vpop.permute.xlu1 %571 }
 0xa0f   :  { %2191 = shalt.err (!%p2188_p2)  }
 0xa10   :  { %s2192_s23 = scalar_lea.vmem %s52_s6, 20480  ;;  %p2197_p4 = scmp.lt.s32.totalorder %s52_s6, %s52_s6 }
 0xa11   :  { %p2193_p3 = scmp.ne.s32.totalorder %s52_s6, %s2192_s23  ;;  %p2198_p5 = scmp.lt.s32.totalorder %s2192_s23, %s2192_s23 }
 0xa13   :  { %p2199_p6 = por %p2198_p5, %p2197_p4 }
 0xa15   :  { %p2200_p7 = pnand %p2199_p6, %p2193_p3 }
 0xa17   :  { %2203 = shalt.err (!%p2200_p7)  }
 0xa18   :  { %54 = dma.hbm_to_vmem [thread:$0]  %s2612_s8, 20480, %s52_s6, [#allocation4]  ;;  %v574_v50 = vadd.f32 %v572_v49, %v564_v48 }
 0xa19   :  { %s2204_s5 = scalar_lea.hbm %s2615_s11, 12288 }
 0xa1a   :  { %p2205_p8 = scmp.ne.s32.totalorder %s2615_s11, %s2204_s5  ;;  %p2208_p9 = scmp.lt.u32.totalorder %s2204_s5, %s2615_s11 }
 0xa1c   :  { %p2210_p10 = pnand %p2208_p9, %p2205_p8 }
 0xa1e   :  { %2213 = shalt.err (!%p2210_p10)  }
 0xa1f   :  { %s2214_s15 = scalar_lea.vmem %s64_s16, 12288  ;;  %p2219_p12 = scmp.lt.s32.totalorder %s64_s16, %s64_s16 }
 0xa20   :  { %p2215_p11 = scmp.ne.s32.totalorder %s64_s16, %s2214_s15  ;;  %p2220_p13 = scmp.lt.s32.totalorder %s2214_s15, %s2214_s15 }
 0xa22   :  { %p2221_p0 = por %p2220_p13, %p2219_p12 }
 0xa24   :  { %p2222_p1 = pnand %p2221_p0, %p2215_p11 }
 0xa26   :  { %2225 = shalt.err (!%p2222_p1)  }
 0xa27   :  { %66 = dma.hbm_to_vmem [thread:$0]  %s2615_s11, 12288, %s64_s16, [#allocation4 + $0x1]  ;;  %2180 = vtanh.f32 %v574_v50 }
 0xa31   :  { %v2181_v51 = vpop.eup %2180 }
 0xa32   :  { %577 = vrot.lane.b32.xlu0 %v2181_v51, %s2257_s29 }
 0xaa4   :  { %v578_v52 = vpop.permute.xlu0 %577 }
 0xaa5   :  { %v2493_v53 = vmul.f32 %v2179_v28, %v578_v52 }
 0xaa6   :  { %2248 = dma.done.wait [#allocation4], 20480 }
 0xaa7   :  { %2249 = vsyncadd [#allocation4], 4294946816  ;;  %vm707_vm3 = vcmask 1045504   ;;  %v710_v54 = vrot.slane %v2462_v38, 1  ;;  %v714_v55 = vrot.slane %v2464_v43, 5  ;;  %1124 = vmatprep.mubr.f32.mxu1 %v2256_v10  ;;  %v747_v57 = vld [vmem:[#allocation2 + $0x8] sm:$0xff] }
 0xaa8   :  { %v749_v58 = vld [vmem:[#allocation2 + $0x18] sm:$0xff]  ;;  %v746_v59 = vld [vmem:[#allocation2] sm:$0xff]  ;;  %v748_v61 = vld [vmem:[#allocation2 + $0x10] sm:$0xff]  ;;  %vm741_vm4 = vcmask 1043456   ;;  %vm713_vm5 = vcmask 1042432   ;;  %vm729_vm6 = vcmask 1044480  }
 0xaa9   :  { %v719_v56 = vsel %vm707_vm3, %v710_v54, %v714_v55  ;;  %v1877_v60 = vpack.c.bf16 %v749_v58, %v747_v57  ;;  %v751_v62 = vld [vmem:[#allocation2 + $0x28] sm:$0xff]  ;;  %v753_v63 = vld [vmem:[#allocation2 + $0x38] sm:$0xff]  ;;  %v1879_v0 = vpack.c.bf16 %v748_v61, %v746_v59  ;;  %v750_v2 = vld [vmem:[#allocation2 + $0x20] sm:$0xff]  ;;  %vm734_vm7 = vcmask 1040384  }
 0xaaa   :  { %970 = vmatprep.mubr.f32.mxu0 %v719_v56  ;;  %v1881_v1 = vpack.c.bf16 %v753_v63, %v751_v62  ;;  %v752_v4 = vld [vmem:[#allocation2 + $0x30] sm:$0xff]  ;;  %v755_v5 = vld [vmem:[#allocation2 + $0x48] sm:$0xff]  ;;  %v757_v6 = vld [vmem:[#allocation2 + $0x58] sm:$0xff]  ;;  %vm722_vm8 = vcmask 1041408  }
 0xaab   :  { %1878 = vmatprep.subr.bf16.mxu0 %v1877_v60  ;;  %v1883_v7 = vpack.c.bf16 %v752_v4, %v750_v2  ;;  %v1885_v8 = vpack.c.bf16 %v757_v6, %v755_v5  ;;  %v754_v9 = vld [vmem:[#allocation2 + $0x40] sm:$0xff]  ;;  %v756_v11 = vld [vmem:[#allocation2 + $0x50] sm:$0xff]  ;;  %v759_v12 = vld [vmem:[#allocation2 + $0x68] sm:$0xff] }
 0xaac   :  { %1880 = vmatpush1.bf16.msra.mxu0 %v1879_v0  ;;  %v761_v14 = vld [vmem:[#allocation2 + $0x78] sm:$0xff]  ;;  %v1887_v15 = vpack.c.bf16 %v756_v11, %v754_v9  ;;  %v758_v17 = vld [vmem:[#allocation2 + $0x60] sm:$0xff]  ;;  %v760_v18 = vld [vmem:[#allocation2 + $0x70] sm:$0xff] }
 0xaad   :  { %1882 = vmatprep.subr.bf16.mxu0 %v1881_v1  ;;  %v1889_v16 = vpack.c.bf16 %v761_v14, %v759_v12  ;;  %v763_v19 = vld [vmem:[#allocation2 + $0x88] sm:$0xff]  ;;  %v765_v20 = vld [vmem:[#allocation2 + $0x98] sm:$0xff]  ;;  %v1891_v13 = vpack.c.bf16 %v760_v18, %v758_v17  ;;  %v762_v22 = vld [vmem:[#allocation2 + $0x80] sm:$0xff] }
 0xaae   :  { %v1893_v21 = vpack.c.bf16 %v765_v20, %v763_v19  ;;  %v764_v23 = vld [vmem:[#allocation2 + $0x90] sm:$0xff]  ;;  %v767_v24 = vld [vmem:[#allocation2 + $0xa8] sm:$0xff]  ;;  %v769_v3 = vld [vmem:[#allocation2 + $0xb8] sm:$0xff] }
 0xaaf   :  { %v1895_v25 = vpack.c.bf16 %v764_v23, %v762_v22  ;;  %v1897_v26 = vpack.c.bf16 %v769_v3, %v767_v24  ;;  %v766_v27 = vld [vmem:[#allocation2 + $0xa0] sm:$0xff]  ;;  %v768_v28 = vld [vmem:[#allocation2 + $0xb0] sm:$0xff]  ;;  %v771_v29 = vld [vmem:[#allocation2 + $0xc8] sm:$0xff] }
 0xab0   :  { %1884 = vmatpush1.bf16.msra.mxu0 %v1883_v7  ;;  %v773_v30 = vld [vmem:[#allocation2 + $0xd8] sm:$0xff]  ;;  %v1899_v31 = vpack.c.bf16 %v768_v28, %v766_v27  ;;  %v770_v33 = vld [vmem:[#allocation2 + $0xc0] sm:$0xff]  ;;  %v772_v34 = vld [vmem:[#allocation2 + $0xd0] sm:$0xff] }
 0xab1   :  { %1886 = vmatprep.subr.bf16.mxu0 %v1885_v8  ;;  %v1901_v32 = vpack.c.bf16 %v773_v30, %v771_v29  ;;  %v775_v35 = vld [vmem:[#allocation2 + $0xe8] sm:$0xff]  ;;  %v777_v36 = vld [vmem:[#allocation2 + $0xf8] sm:$0xff]  ;;  %v1903_v37 = vpack.c.bf16 %v772_v34, %v770_v33  ;;  %v774_v40 = vld [vmem:[#allocation2 + $0xe0] sm:$0xff] }
 0xab2   :  { %v1905_v39 = vpack.c.bf16 %v777_v36, %v775_v35  ;;  %v776_v41 = vld [vmem:[#allocation2 + $0xf0] sm:$0xff]  ;;  %v779_v42 = vld [vmem:[#allocation2 + $0x108] sm:$0xff]  ;;  %v781_v44 = vld [vmem:[#allocation2 + $0x118] sm:$0xff] }
 0xab3   :  { %v1907_v45 = vpack.c.bf16 %v776_v41, %v774_v40  ;;  %v1909_v46 = vpack.c.bf16 %v781_v44, %v779_v42  ;;  %v778_v48 = vld [vmem:[#allocation2 + $0x100] sm:$0xff]  ;;  %v780_v49 = vld [vmem:[#allocation2 + $0x110] sm:$0xff]  ;;  %v783_v50 = vld [vmem:[#allocation2 + $0x128] sm:$0xff] }
 0xab4   :  { %1888 = vmatpush1.bf16.msra.mxu0 %v1887_v15  ;;  %v785_v51 = vld [vmem:[#allocation2 + $0x138] sm:$0xff]  ;;  %v1911_v52 = vpack.c.bf16 %v780_v49, %v778_v48  ;;  %v782_v54 = vld [vmem:[#allocation2 + $0x120] sm:$0xff]  ;;  %v875_v56 = vld [vmem:[#allocation2 + $0x408] sm:$0xff] }
 0xab5   :  { %1890 = vmatprep.subr.bf16.mxu0 %v1889_v16  ;;  %v877_v57 = vld [vmem:[#allocation2 + $0x418] sm:$0xff]  ;;  %v1913_v58 = vpack.c.bf16 %v785_v51, %v783_v50  ;;  %v784_v59 = vld [vmem:[#allocation2 + $0x130] sm:$0xff]  ;;  %v874_v61 = vld [vmem:[#allocation2 + $0x400] sm:$0xff] }
 0xab6   :  { %v2005_v60 = vpack.c.bf16 %v877_v57, %v875_v56  ;;  %v876_v62 = vld [vmem:[#allocation2 + $0x410] sm:$0xff]  ;;  %v787_v63 = vld [vmem:[#allocation2 + $0x148] sm:$0xff]  ;;  %v789_v0 = vld [vmem:[#allocation2 + $0x158] sm:$0xff]  ;;  %v1915_v5 = vpack.c.bf16 %v784_v59, %v782_v54 }
 0xab7   :  { %v2007_v1 = vpack.c.bf16 %v876_v62, %v874_v61  ;;  %v879_v2 = vld [vmem:[#allocation2 + $0x428] sm:$0xff]  ;;  %v881_v4 = vld [vmem:[#allocation2 + $0x438] sm:$0xff]  ;;  %v786_v6 = vld [vmem:[#allocation2 + $0x140] sm:$0xff]  ;;  %v1917_v11 = vpack.c.bf16 %v789_v0, %v787_v63 }
 0xab8   :  { %1892 = vmatpush1.bf16.msra.mxu0 %v1891_v13  ;;  %2006 = vmatprep.subr.bf16.mxu1 %v2005_v60  ;;  %v2009_v7 = vpack.c.bf16 %v881_v4, %v879_v2  ;;  %v878_v8 = vld [vmem:[#allocation2 + $0x420] sm:$0xff]  ;;  %v880_v9 = vld [vmem:[#allocation2 + $0x430] sm:$0xff]  ;;  %v883_v15 = vld [vmem:[#allocation2 + $0x448] sm:$0xff] }
 0xab9   :  { %1894 = vmatprep.subr.bf16.mxu0 %v1893_v21  ;;  %2008 = vmatpush1.bf16.msra.mxu1 %v2007_v1  ;;  %v788_v12 = vld [vmem:[#allocation2 + $0x150] sm:$0xff]  ;;  %v2011_v14 = vpack.c.bf16 %v880_v9, %v878_v8  ;;  %v885_v16 = vld [vmem:[#allocation2 + $0x458] sm:$0xff]  ;;  %v791_v17 = vld [vmem:[#allocation2 + $0x168] sm:$0xff] }
 0xaba   :  { %v793_v18 = vld [vmem:[#allocation2 + $0x178] sm:$0xff]  ;;  %2010 = vmatprep.subr.bf16.mxu1 %v2009_v7  ;;  %v2013_v19 = vpack.c.bf16 %v885_v16, %v883_v15  ;;  %v882_v20 = vld [vmem:[#allocation2 + $0x440] sm:$0xff]  ;;  %v884_v13 = vld [vmem:[#allocation2 + $0x450] sm:$0xff]  ;;  %v1919_v21 = vpack.c.bf16 %v788_v12, %v786_v6 }
 0xabb   :  { %v790_v22 = vld [vmem:[#allocation2 + $0x160] sm:$0xff]  ;;  %v2015_v23 = vpack.c.bf16 %v884_v13, %v882_v20  ;;  %v887_v24 = vld [vmem:[#allocation2 + $0x468] sm:$0xff]  ;;  %v889_v3 = vld [vmem:[#allocation2 + $0x478] sm:$0xff] }
 0xabc   :  { %1896 = vmatpush1.bf16.msra.mxu0 %v1895_v25  ;;  %v1921_v25 = vpack.c.bf16 %v793_v18, %v791_v17  ;;  %v2017_v27 = vpack.c.bf16 %v889_v3, %v887_v24  ;;  %v886_v28 = vld [vmem:[#allocation2 + $0x460] sm:$0xff]  ;;  %v888_v29 = vld [vmem:[#allocation2 + $0x470] sm:$0xff]  ;;  %v795_v30 = vld [vmem:[#allocation2 + $0x188] sm:$0xff]  ;;  %v705_v24 = vrot.slane %v2464_v43, 4 }
 0xabd   :  { %1898 = vmatprep.subr.bf16.mxu0 %v1897_v26  ;;  %2012 = vmatpush1.bf16.msra.mxu1 %v2011_v14  ;;  %v792_v26 = vld [vmem:[#allocation2 + $0x170] sm:$0xff]  ;;  %v893_v33 = vld [vmem:[#allocation2 + $0x498] sm:$0xff]  ;;  %v794_v35 = vld [vmem:[#allocation2 + $0x180] sm:$0xff] }
 0xabe   :  { %2014 = vmatprep.subr.bf16.mxu1 %v2013_v19  ;;  %v1923_v34 = vpack.c.bf16 %v792_v26, %v790_v22  ;;  %v796_v36 = vld [vmem:[#allocation2 + $0x190] sm:$0xff]  ;;  %v799_v40 = vld [vmem:[#allocation2 + $0x1a8] sm:$0xff]  ;;  %v890_v42 = vld [vmem:[#allocation2 + $0x480] sm:$0xff] }
 0xabf   :  { %v892_v44 = vld [vmem:[#allocation2 + $0x490] sm:$0xff]  ;;  %v897_v48 = vld [vmem:[#allocation2 + $0x4b8] sm:$0xff]  ;;  %v1927_v49 = vpack.c.bf16 %v796_v36, %v794_v35  ;;  %v798_v50 = vld [vmem:[#allocation2 + $0x1a0] sm:$0xff]  ;;  %v708_v35 = vsel %vm707_vm3, %v2462_v38, %v705_v24 }
 0xac0   :  { %1900 = vmatpush1.bf16.msra.mxu0 %v1899_v31  ;;  %v797_v31 = vld [vmem:[#allocation2 + $0x198] sm:$0xff]  ;;  %v800_v51 = vld [vmem:[#allocation2 + $0x1b0] sm:$0xff]  ;;  %v803_v56 = vld [vmem:[#allocation2 + $0x1c8] sm:$0xff] }
 0xac1   :  { %1902 = vmatprep.subr.bf16.mxu0 %v1901_v32  ;;  %v891_v32 = vld [vmem:[#allocation2 + $0x488] sm:$0xff]  ;;  %2016 = vmatpush1.bf16.msra.mxu1 %v2015_v23  ;;  %v896_v59 = vld [vmem:[#allocation2 + $0x4b0] sm:$0xff]  ;;  %v805_v60 = vld [vmem:[#allocation2 + $0x1d8] sm:$0xff]  ;;  %v1931_v63 = vpack.c.bf16 %v800_v51, %v798_v50 }
 0xac2   :  { %2018 = vmatprep.subr.bf16.mxu1 %v2017_v27  ;;  %v2021_v41 = vpack.c.bf16 %v893_v33, %v891_v32  ;;  %v899_v61 = vld [vmem:[#allocation2 + $0x4c8] sm:$0xff]  ;;  %v901_v62 = vld [vmem:[#allocation2 + $0x4d8] sm:$0xff]  ;;  %v802_v0 = vld [vmem:[#allocation2 + $0x1c0] sm:$0xff]  ;;  %v1933_v4 = vpack.c.bf16 %v805_v60, %v803_v56  ;;  %v730_v33 = vrot.slane %v2462_v38, 3 }
 0xac3   :  { %v804_v1 = vld [vmem:[#allocation2 + $0x1d0] sm:$0xff]  ;;  %v2029_v6 = vpack.c.bf16 %v901_v62, %v899_v61  ;;  %v898_v7 = vld [vmem:[#allocation2 + $0x4c0] sm:$0xff]  ;;  %v809_v9 = vld [vmem:[#allocation2 + $0x1f8] sm:$0xff] }
 0xac4   :  { %1904 = vmatpush1.bf16.msra.mxu0 %v1903_v37  ;;  %v2019_v37 = vpack.c.bf16 %v888_v29, %v886_v28  ;;  %v900_v8 = vld [vmem:[#allocation2 + $0x4d0] sm:$0xff]  ;;  %v905_v12 = vld [vmem:[#allocation2 + $0x4f8] sm:$0xff]  ;;  %v1935_v14 = vpack.c.bf16 %v804_v1, %v802_v0  ;;  %v806_v15 = vld [vmem:[#allocation2 + $0x1e0] sm:$0xff]  ;;  %v715_v29 = vrot.slane %v2466_v47, 5 }
 0xac5   :  { %1906 = vmatprep.subr.bf16.mxu0 %v1905_v39  ;;  %v1925_v39 = vpack.c.bf16 %v797_v31, %v795_v30  ;;  %v2031_v16 = vpack.c.bf16 %v900_v8, %v898_v7  ;;  %v808_v18 = vld [vmem:[#allocation2 + $0x1f0] sm:$0xff]  ;;  %v902_v20 = vld [vmem:[#allocation2 + $0x4e0] sm:$0xff]  ;;  %v811_v22 = vld [vmem:[#allocation2 + $0x208] sm:$0xff] }
 0xac6   :  { %2020 = vmatpush1.bf16.msra.mxu1 %v2019_v37  ;;  %v904_v13 = vld [vmem:[#allocation2 + $0x4f0] sm:$0xff]  ;;  %v813_v23 = vld [vmem:[#allocation2 + $0x218] sm:$0xff]  ;;  %v1939_v3 = vpack.c.bf16 %v808_v18, %v806_v15  ;;  %v810_v27 = vld [vmem:[#allocation2 + $0x200] sm:$0xff] }
 0xac7   :  { %2022 = vmatprep.subr.bf16.mxu1 %v2021_v41  ;;  %v1941_v26 = vpack.c.bf16 %v813_v23, %v811_v22  ;;  %v812_v28 = vld [vmem:[#allocation2 + $0x210] sm:$0xff]  ;;  %v815_v31 = vld [vmem:[#allocation2 + $0x228] sm:$0xff]  ;;  %v817_v32 = vld [vmem:[#allocation2 + $0x238] sm:$0xff] }
 0xac8   :  { %1908 = vmatpush1.bf16.msra.mxu0 %v1907_v45  ;;  %v801_v45 = vld [vmem:[#allocation2 + $0x1b8] sm:$0xff]  ;;  %v1943_v36 = vpack.c.bf16 %v812_v28, %v810_v27  ;;  %v816_v41 = vld [vmem:[#allocation2 + $0x230] sm:$0xff]  ;;  %v818_v51 = vld [vmem:[#allocation2 + $0x240] sm:$0xff] }
 0xac9   :  { %1910 = vmatprep.subr.bf16.mxu0 %v1909_v46  ;;  %v895_v46 = vld [vmem:[#allocation2 + $0x4a8] sm:$0xff]  ;;  %v1929_v54 = vpack.c.bf16 %v801_v45, %v799_v40  ;;  %v814_v40 = vld [vmem:[#allocation2 + $0x220] sm:$0xff]  ;;  %v825_v56 = vld [vmem:[#allocation2 + $0x278] sm:$0xff] }
 0xaca   :  { %v2025_v57 = vpack.c.bf16 %v897_v48, %v895_v46  ;;  %v819_v45 = vld [vmem:[#allocation2 + $0x248] sm:$0xff]  ;;  %v821_v46 = vld [vmem:[#allocation2 + $0x258] sm:$0xff]  ;;  %v824_v60 = vld [vmem:[#allocation2 + $0x270] sm:$0xff] }
 0xacb   :  { %v1949_v50 = vpack.c.bf16 %v821_v46, %v819_v45  ;;  %v827_v61 = vld [vmem:[#allocation2 + $0x288] sm:$0xff]  ;;  %v829_v62 = vld [vmem:[#allocation2 + $0x298] sm:$0xff]  ;;  %v826_v1 = vld [vmem:[#allocation2 + $0x280] sm:$0xff] }
 0xacc   :  { %1912 = vmatpush1.bf16.msra.mxu0 %v1911_v52  ;;  %v2023_v52 = vpack.c.bf16 %v892_v44, %v890_v42  ;;  %v716_v42 = vsel %vm713_vm5, %v714_v55, %v715_v29  ;;  %v735_v44 = vrot.slane %v2464_v43, 7  ;;  %v823_v55 = vld [vmem:[#allocation2 + $0x268] sm:$0xff]  ;;  %v1957_v0 = vpack.c.bf16 %v829_v62, %v827_v61  ;;  %v830_v7 = vld [vmem:[#allocation2 + $0x2a0] sm:$0xff]  ;;  %v832_v8 = vld [vmem:[#allocation2 + $0x2b0] sm:$0xff] }
 0xacd   :  { %1914 = vmatprep.subr.bf16.mxu0 %v1913_v58  ;;  %v894_v58 = vld [vmem:[#allocation2 + $0x4a0] sm:$0xff]  ;;  %v841_v18 = vld [vmem:[#allocation2 + $0x2f8] sm:$0xff]  ;;  %v843_v22 = vld [vmem:[#allocation2 + $0x308] sm:$0xff] }
 0xace   :  { %2024 = vmatpush1.bf16.msra.mxu1 %v2023_v52  ;;  %v2027_v2 = vpack.c.bf16 %v896_v59, %v894_v58  ;;  %v820_v52 = vld [vmem:[#allocation2 + $0x250] sm:$0xff]  ;;  %v1953_v58 = vpack.c.bf16 %v825_v56, %v823_v55  ;;  %v822_v59 = vld [vmem:[#allocation2 + $0x260] sm:$0xff]  ;;  %v845_v23 = vld [vmem:[#allocation2 + $0x318] sm:$0xff] }
 0xacf   :  { %2026 = vmatprep.subr.bf16.mxu1 %v2025_v57  ;;  %v1951_v57 = vpack.c.bf16 %v820_v52, %v818_v51  ;;  %v834_v15 = vld [vmem:[#allocation2 + $0x2c0] sm:$0xff]  ;;  %v847_v27 = vld [vmem:[#allocation2 + $0x328] sm:$0xff]  ;;  %v849_v28 = vld [vmem:[#allocation2 + $0x338] sm:$0xff] }
 0xad0   :  { %1916 = vmatpush1.bf16.msra.mxu0 %v1915_v5  ;;  %v807_v5 = vld [vmem:[#allocation2 + $0x1e8] sm:$0xff]  ;;  %v854_v46 = vld [vmem:[#allocation2 + $0x360] sm:$0xff]  ;;  %v860_v55 = vld [vmem:[#allocation2 + $0x390] sm:$0xff] }
 0xad1   :  { %1918 = vmatprep.subr.bf16.mxu0 %v1917_v11  ;;  %v903_v11 = vld [vmem:[#allocation2 + $0x4e8] sm:$0xff]  ;;  %v1937_v17 = vpack.c.bf16 %v809_v9, %v807_v5  ;;  %v864_v61 = vld [vmem:[#allocation2 + $0x3b0] sm:$0xff] }
 0xad2   :  { %2028 = vmatpush1.bf16.msra.mxu1 %v2027_v2  ;;  %v2033_v19 = vpack.c.bf16 %v905_v12, %v903_v11  ;;  %v831_v2 = vld [vmem:[#allocation2 + $0x2a8] sm:$0xff]  ;;  %v837_v11 = vld [vmem:[#allocation2 + $0x2d8] sm:$0xff]  ;;  %v1963_v12 = vpack.c.bf16 %v832_v8, %v830_v7  ;;  %v870_v8 = vld [vmem:[#allocation2 + $0x3e0] sm:$0xff] }
 0xad3   :  { %2030 = vmatprep.subr.bf16.mxu1 %v2029_v6  ;;  %v835_v9 = vld [vmem:[#allocation2 + $0x2c8] sm:$0xff] }
 0xad4   :  { %1920 = vmatpush1.bf16.msra.mxu0 %v1919_v21  ;;  %v742_v21 = vrot.slane %v2462_v38, 4  ;;  %v863_v56 = vld [vmem:[#allocation2 + $0x3a8] sm:$0xff] }
 0xad5   :  { %1922 = vmatprep.subr.bf16.mxu0 %v1921_v25  ;;  %v2035_v25 = vpack.c.bf16 %v904_v13, %v902_v20  ;;  %v838_v13 = vld [vmem:[#allocation2 + $0x2e0] sm:$0xff]  ;;  %v867_v62 = vld [vmem:[#allocation2 + $0x3c8] sm:$0xff] }
 0xad6   :  { %2032 = vmatpush1.bf16.msra.mxu1 %v2031_v16  ;;  %v743_v30 = vsel %vm741_vm4, %v742_v21, %v705_v24  ;;  %v836_v16 = vld [vmem:[#allocation2 + $0x2d0] sm:$0xff] }
 0xad7   :  { %2034 = vmatprep.subr.bf16.mxu1 %v2033_v19  ;;  %v745_v37 = vsel %vm707_vm3, %v743_v30, %v2464_v43  ;;  %v1967_v19 = vpack.c.bf16 %v836_v16, %v834_v15  ;;  %v840_v21 = vld [vmem:[#allocation2 + $0x2f0] sm:$0xff]  ;;  %v1977_v30 = vpack.c.bf16 %v849_v28, %v847_v27  ;;  %v736_v15 = vrot.slane %v2466_v47, 7 }
 0xad8   :  { %1924 = vmatpush1.bf16.msra.mxu0 %v1923_v34  ;;  %v731_v34 = vrot.slane %v2464_v43, 3 }
 0xad9   :  { %1926 = vmatprep.subr.bf16.mxu0 %v1925_v39  ;;  %v1945_v39 = vpack.c.bf16 %v817_v32, %v815_v31  ;;  %v846_v31 = vld [vmem:[#allocation2 + $0x320] sm:$0xff]  ;;  %v848_v32 = vld [vmem:[#allocation2 + $0x330] sm:$0xff] }
 0xada   :  { %2036 = vmatpush1.bf16.msra.mxu1 %v2035_v25  ;;  %v732_v48 = vsel %vm729_vm6, %v730_v33, %v731_v34  ;;  %v842_v25 = vld [vmem:[#allocation2 + $0x300] sm:$0xff]  ;;  %v851_v33 = vld [vmem:[#allocation2 + $0x348] sm:$0xff]  ;;  %v853_v34 = vld [vmem:[#allocation2 + $0x358] sm:$0xff] }
 0xadc   :  { %1928 = vmatpush1.bf16.msra.mxu0 %v1927_v49  ;;  %v1947_v49 = vpack.c.bf16 %v816_v41, %v814_v40  ;;  %v855_v40 = vld [vmem:[#allocation2 + $0x368] sm:$0xff]  ;;  %v857_v41 = vld [vmem:[#allocation2 + $0x378] sm:$0xff] }
 0xadd   :  { %1930 = vmatprep.subr.bf16.mxu0 %v1929_v54  ;;  %1125 = vmatmul.mubr.f32.vlgmr.msra.gmra.mrb[10].mxu1 %v745_v37  ;;  %v740_v54 = vsel %vm707_vm3, %v732_v48, %v735_v44  ;;  %v850_v37 = vld [vmem:[#allocation2 + $0x340] sm:$0xff]  ;;  %v1985_v45 = vpack.c.bf16 %v857_v41, %v855_v40  ;;  %v856_v48 = vld [vmem:[#allocation2 + $0x370] sm:$0xff] }
 0xade   :  { %1130 = vmatprep.mubr.f32.mxu1 %v2256_v10  ;;  %v828_v10 = vld [vmem:[#allocation2 + $0x290] sm:$0xff]  ;;  %v1987_v51 = vpack.c.bf16 %v856_v48, %v854_v46 }
 0xadf   :  { %v1959_v5 = vpack.c.bf16 %v828_v10, %v826_v1  ;;  %v866_v10 = vld [vmem:[#allocation2 + $0x3c0] sm:$0xff] }
 0xae0   :  { %1932 = vmatpush1.bf16.msra.mxu0 %v1931_v63  ;;  %v1955_v63 = vpack.c.bf16 %v824_v60, %v822_v59  ;;  %v862_v60 = vld [vmem:[#allocation2 + $0x3a0] sm:$0xff] }
 0xae1   :  { %1934 = vmatprep.subr.bf16.mxu0 %v1933_v4  ;;  %1131 = vmatmul.mubr.f32.gmra.mrb[12].mxu1 %v2466_v47  ;;  %v833_v4 = vld [vmem:[#allocation2 + $0x2b8] sm:$0xff] }
 0xae2   :  { %v1961_v6 = vpack.c.bf16 %v833_v4, %v831_v2  ;;  %v868_v2 = vld [vmem:[#allocation2 + $0x3d0] sm:$0xff]  ;;  %v871_v4 = vld [vmem:[#allocation2 + $0x3e8] sm:$0xff] }
 0xae4   :  { %1936 = vmatpush1.bf16.msra.mxu0 %v1935_v14  ;;  %v1965_v14 = vpack.c.bf16 %v837_v11, %v835_v9  ;;  %v872_v9 = vld [vmem:[#allocation2 + $0x3f0] sm:$0xff] }
 0xae5   :  { %1938 = vmatprep.subr.bf16.mxu0 %v1937_v17  ;;  %v839_v17 = vld [vmem:[#allocation2 + $0x2e8] sm:$0xff]  ;;  %v2003_v11 = vpack.c.bf16 %v872_v9, %v870_v8 }
 0xae6   :  { %v1969_v20 = vpack.c.bf16 %v841_v18, %v839_v17  ;;  %v724_v17 = vrot.slane %v2466_v47, 6  ;;  %v737_v18 = vsel %vm734_vm7, %v735_v44, %v736_v15  ;;  %v1153_v44 = vld [vmem:[%s2614_s10] sm:$0x3] }
 0xae8   :  { %1940 = vmatpush1.bf16.msra.mxu0 %v1939_v3  ;;  %v1973_v3 = vpack.c.bf16 %v845_v23, %v843_v22  ;;  %v1139_v22 = vlaneseq }
 0xae9   :  { %1942 = vmatprep.subr.bf16.mxu0 %v1941_v26  ;;  %v844_v26 = vld [vmem:[#allocation2 + $0x310] sm:$0xff] }
 0xaea   :  { %v1975_v29 = vpack.c.bf16 %v844_v26, %v842_v25  ;;  %v2528_v23 = vshrl.u32 %v1139_v22, 7 }
 0xaeb   :  { %971 = vmatmul.mubr.f32.vlgmr.msra.gmra.mrb[8].mxu0 %v708_v35  ;;  %v1979_v35 = vpack.c.bf16 %v848_v32, %v846_v31 }
 0xaec   :  { %1944 = vmatpush1.bf16.msra.mxu0 %v1943_v36  ;;  %976 = vmatprep.mubr.f32.mxu0 %v716_v42  ;;  %v1981_v36 = vpack.c.bf16 %v853_v34, %v851_v33  ;;  %v1145_v47 = vsub.s32 1, %v2528_v23 }
 0xaed   :  { %1946 = vmatprep.subr.bf16.mxu0 %v1945_v39  ;;  %v852_v39 = vld [vmem:[#allocation2 + $0x350] sm:$0xff] }
 0xaee   :  { %v1983_v42 = vpack.c.bf16 %v852_v39, %v850_v37  ;;  %v1162_v31 = vrot.slane %v1153_v44, %v1145_v47 }
 0xaef   :  { %977 = vmatmul.mubr.f32.gmra.mrb[10].mxu0 %v705_v24  ;;  %v1971_v24 = vpack.c.bf16 %v840_v21, %v838_v13 }
 0xaf0   :  { %1948 = vmatpush1.bf16.msra.mxu0 %v1947_v49  ;;  %1047 = vmatprep.mubr.f32.mxu0 %v740_v54  ;;  %v859_v49 = vld [vmem:[#allocation2 + $0x388] sm:$0xff]  ;;  %v858_v54 = vld [vmem:[#allocation2 + $0x380] sm:$0xff] }
 0xaf1   :  { %1950 = vmatprep.subr.bf16.mxu0 %v1949_v50  ;;  %v861_v50 = vld [vmem:[#allocation2 + $0x398] sm:$0xff] }
 0xaf2   :  { %v1989_v52 = vpack.c.bf16 %v861_v50, %v859_v49 }
 0xaf4   :  { %1952 = vmatpush1.bf16.msra.mxu0 %v1951_v57  ;;  %v865_v57 = vld [vmem:[#allocation2 + $0x3b8] sm:$0xff] }
 0xaf5   :  { %1954 = vmatprep.subr.bf16.mxu0 %v1953_v58  ;;  %v1991_v58 = vpack.c.bf16 %v860_v55, %v858_v54  ;;  %v1993_v59 = vpack.c.bf16 %v865_v57, %v863_v56 }
 0xaf8   :  { %1956 = vmatpush1.bf16.msra.mxu0 %v1955_v63  ;;  %v869_v63 = vld [vmem:[#allocation2 + $0x3d8] sm:$0xff] }
 0xaf9   :  { %1958 = vmatprep.subr.bf16.mxu0 %v1957_v0  ;;  %v1995_v0 = vpack.c.bf16 %v864_v61, %v862_v60  ;;  %v1997_v1 = vpack.c.bf16 %v869_v63, %v867_v62 }
 0xafc   :  { %1960 = vmatpush1.bf16.msra.mxu0 %v1959_v5  ;;  %v873_v5 = vld [vmem:[#allocation2 + $0x3f8] sm:$0xff] }
 0xafd   :  { %1962 = vmatprep.subr.bf16.mxu0 %v1961_v6  ;;  %v1999_v6 = vpack.c.bf16 %v868_v2, %v866_v10  ;;  %v2001_v7 = vpack.c.bf16 %v873_v5, %v871_v4 }
 0xb00   :  { %1964 = vmatpush1.bf16.msra.mxu0 %v1963_v12  ;;  %v720_v12 = vrot.slane %v2462_v38, 2 }
 0xb01   :  { %1966 = vmatprep.subr.bf16.mxu0 %v1965_v14  ;;  %v723_v14 = vrot.slane %v2464_v43, 6  ;;  %v1137_v43 = vld [vmem:[%s2613_s9] sm:$0x3] }
 0xb02   :  { %v1146_v26 = vrot.slane %v1137_v43, %v1145_v47 }
 0xb03   :  { %v728_v16 = vsel %vm707_vm3, %v720_v12, %v723_v14 }
 0xb04   :  { %1968 = vmatpush1.bf16.msra.mxu0 %v1967_v19  ;;  %v725_v19 = vsel %vm722_vm8, %v723_v14, %v724_v17 }
 0xb05   :  { %1970 = vmatprep.subr.bf16.mxu0 %v1969_v20 }
 0xb08   :  { %1972 = vmatpush1.bf16.msra.mxu0 %v1971_v24  ;;  %v1141_v24 = vsub.s32 0, %v2528_v23 }
 0xb09   :  { %1974 = vmatprep.subr.bf16.mxu0 %v1973_v3 }
 0xb0a   :  { %v1142_v3 = vrot.slane %v1137_v43, %v1141_v24  ;;  %v1158_v28 = vrot.slane %v1153_v44, %v1141_v24 }
 0xb0c   :  { %1976 = vmatpush1.bf16.msra.mxu0 %v1975_v29 }
 0xb0d   :  { %1978 = vmatprep.subr.bf16.mxu0 %v1977_v30 }
 0xb10   :  { %1980 = vmatpush1.bf16.msra.mxu0 %v1979_v35 }
 0xb11   :  { %1982 = vmatprep.subr.bf16.mxu0 %v1981_v36 }
 0xb14   :  { %1984 = vmatpush1.bf16.msra.mxu0 %v1983_v42 }
 0xb15   :  { %1986 = vmatprep.subr.bf16.mxu0 %v1985_v45 }
 0xb18   :  { %1988 = vmatpush1.bf16.msra.mxu0 %v1987_v51 }
 0xb19   :  { %1990 = vmatprep.subr.bf16.mxu0 %v1989_v52 }
 0xb1c   :  { %1992 = vmatpush1.bf16.msra.mxu0 %v1991_v58 }
 0xb1d   :  { %1994 = vmatprep.subr.bf16.mxu0 %v1993_v59 }
 0xb20   :  { %1996 = vmatpush1.bf16.msra.mxu0 %v1995_v0 }
 0xb21   :  { %1998 = vmatprep.subr.bf16.mxu0 %v1997_v1 }
 0xb24   :  { %2000 = vmatpush1.bf16.msra.mxu0 %v1999_v6 }
 0xb25   :  { %2002 = vmatprep.subr.bf16.mxu0 %v2001_v7 }
 0xb28   :  { %2004 = vmatpush1.bf16.msra.mxu0 %v2003_v11 }
 0xb2b   :  { %1048 = vmatmul.mubr.f32.vlgmr.msra.gmra.mrb[8].mxu0 %v728_v16 }
 0xb2c   :  { %1053 = vmatprep.mubr.f32.mxu0 %v737_v18 }
 0xb2f   :  { %1054 = vmatmul.mubr.f32.gmra.mrb[10].mxu0 %v725_v19 }
 0xbb0   :  { %v1126_v38 = vpop.f32.mrb[10].mxu1 }
 0xbb1   :  { %v1128_v20 = vpop.f32.mrb[11].mxu1 }
 0xbb4   :  { %v1132_v13 = vpop.f32.mrb[12].mxu1 }
 0xbb5   :  { %v1134_v21 = vpop.f32.mrb[13].mxu1 }
 0xbfe   :  { %v1049_v25 = vpop.f32.mrb[8].mxu0 }
 0xbff   :  { %v2133_v27 = vadd.f32 %v1126_v38, %v1049_v25  ;;  %v1051_v29 = vpop.f32.mrb[9].mxu0 }
 0xc00   :  { %v2134_v30 = vadd.f32 %v1128_v20, %v1051_v29 }
 0xc01   :  { %v1149_v32 = vmul.f32 %v2133_v27, %v1142_v3 }
 0xc02   :  { %v1150_v33 = vmul.f32 %v2134_v30, %v1146_v26  ;;  %v1055_v34 = vpop.f32.mrb[10].mxu0 }
 0xc03   :  { %v1165_v35 = vadd.f32 %v1158_v28, %v1149_v32  ;;  %v2135_v36 = vadd.f32 %v1132_v13, %v1055_v34  ;;  %v1057_v37 = vpop.f32.mrb[11].mxu0 }
 0xc04   :  { %v1166_v39 = vadd.f32 %v1162_v31, %v1150_v33  ;;  %v2136_v40 = vadd.f32 %v1134_v21, %v1057_v37 }
 0xc05   :  { %v2538_v41 = vmax.f32 %v1165_v35, 0.0  ;;  %v1151_v42 = vmul.f32 %v2135_v36, %v1142_v3 }
 0xc06   :  { %v2540_v45 = vmax.f32 %v1166_v39, 0.0  ;;  %v1152_v46 = vmul.f32 %v2136_v40, %v1146_v26 }
 0xc07   :  { %v1167_v48 = vadd.f32 %v1158_v28, %v1151_v42 }
 0xc08   :  { %v1168_v49 = vadd.f32 %v1162_v31, %v1152_v46 }
 0xc09   :  { %v2542_v50 = vmax.f32 %v1167_v48, 0.0 }
 0xc0a   :  { %v2544_v51 = vmax.f32 %v1168_v49, 0.0 }
 0xc0b   :  { %2250 = dma.done.wait [#allocation4 + $0x1], 12288 }
 0xc0c   :  { %2251 = vsyncadd [#allocation4 + $0x1], 4294955008  ;;  %v1183_v52 = vrot.slane %v2540_v45, 2  ;;  %v1184_v54 = vrot.slane %v2544_v51, 2  ;;  %v1228_v57 = vld [vmem:[#allocation3 + $0x80] sm:$0xff]  ;;  %v1229_v58 = vld [vmem:[#allocation3 + $0x88] sm:$0xff] }
 0xc0d   :  { %v1212_v59 = vld [vmem:[#allocation3] sm:$0xff]  ;;  %v2037_v60 = vpack.c.bf16 %v1229_v58, %v1228_v57  ;;  %v1213_v61 = vld [vmem:[#allocation3 + $0x8] sm:$0xff]  ;;  %v1230_v62 = vld [vmem:[#allocation3 + $0x90] sm:$0xff]  ;;  %v1180_v37 = vrot.slane %v2538_v41, 2  ;;  %v1181_v39 = vrot.slane %v2542_v50, 2  ;;  %v1197_v46 = vrot.slane %v2540_v45, 3 }
 0xc0e   :  { %v1185_v55 = vsel %vm707_vm3, %v1183_v52, %v1184_v54  ;;  %v1231_v63 = vld [vmem:[#allocation3 + $0x98] sm:$0xff]  ;;  %v2039_v0 = vpack.c.bf16 %v1213_v61, %v1212_v59  ;;  %v1214_v10 = vld [vmem:[#allocation3 + $0x10] sm:$0xff]  ;;  %v1232_v4 = vld [vmem:[#allocation3 + $0xa0] sm:$0xff]  ;;  %v1198_v48 = vrot.slane %v2544_v51, 3  ;;  %v1191_v58 = vrot.slane %v2540_v45, 1 }
 0xc0f   :  { %v1189_v56 = vsel %vm741_vm4, %v2540_v45, %v1185_v55  ;;  %v2041_v1 = vpack.c.bf16 %v1231_v63, %v1230_v62  ;;  %v1215_v2 = vld [vmem:[#allocation3 + $0x18] sm:$0xff]  ;;  %2038 = vmatprep.subr.bf16.mxu1 %v2037_v60  ;;  %v1233_v5 = vld [vmem:[#allocation3 + $0xa8] sm:$0xff]  ;;  %v1216_v8 = vld [vmem:[#allocation3 + $0x20] sm:$0xff]  ;;  %v1182_v54 = vsel %vm707_vm3, %v1180_v37, %v1181_v39  ;;  %v1194_v39 = vrot.slane %v2538_v41, 3 }
 0xc10   :  { %1372 = vmatprep.mubr.f32.mxu1 %v1189_v56  ;;  %2040 = vmatpush3.bf16.msra.mxu1 %v2039_v0  ;;  %v2043_v6 = vpack.c.bf16 %v1215_v2, %v1214_v10  ;;  %v2045_v7 = vpack.c.bf16 %v1233_v5, %v1232_v4  ;;  %v1217_v9 = vld [vmem:[#allocation3 + $0x28] sm:$0xff]  ;;  %v1234_v11 = vld [vmem:[#allocation3 + $0xb0] sm:$0xff]  ;;  %v1235_v12 = vld [vmem:[#allocation3 + $0xb8] sm:$0xff]  ;;  %v1199_v61 = vsel %vm729_vm6, %v1197_v46, %v1198_v48  ;;  %vm1582_vm9 = vcmask 1041664  }
 0xc11   :  { %2042 = vmatprep.subr.bf16.mxu1 %v2041_v1  ;;  %v2047_v14 = vpack.c.bf16 %v1217_v9, %v1216_v8  ;;  %v2049_v15 = vpack.c.bf16 %v1235_v12, %v1234_v11  ;;  %v1218_v16 = vld [vmem:[#allocation3 + $0x30] sm:$0xff]  ;;  %v1219_v17 = vld [vmem:[#allocation3 + $0x38] sm:$0xff]  ;;  %v1236_v18 = vld [vmem:[#allocation3 + $0xc0] sm:$0xff]  ;;  %v1188_v62 = vsel %vm741_vm4, %v2538_v41, %v1182_v54  ;;  %v1203_v2 = vsel %vm741_vm4, %v1191_v58, %v1199_v61 }
 0xc12   :  { %v1237_v19 = vld [vmem:[#allocation3 + $0xc8] sm:$0xff]  ;;  %v2051_v38 = vpack.c.bf16 %v1219_v17, %v1218_v16  ;;  %v1220_v13 = vld [vmem:[#allocation3 + $0x40] sm:$0xff]  ;;  %v1238_v22 = vld [vmem:[#allocation3 + $0xd0] sm:$0xff]  ;;  %v1207_v58 = vrot.slane %v2544_v51, 4  ;;  %vm1583_vm10 = vcmask 257026   ;;  %vm1567_vm11 = vcmask 254976  }
 0xc13   :  { %v2053_v20 = vpack.c.bf16 %v1237_v19, %v1236_v18  ;;  %v1221_v21 = vld [vmem:[#allocation3 + $0x48] sm:$0xff]  ;;  %v1239_v24 = vld [vmem:[#allocation3 + $0xd8] sm:$0xff]  ;;  %v1222_v44 = vld [vmem:[#allocation3 + $0x50] sm:$0xff] }
 0xc14   :  { %2044 = vmatpush3.bf16.msra.mxu1 %v2043_v6  ;;  %v2055_v43 = vpack.c.bf16 %v1221_v21, %v1220_v13  ;;  %v2057_v47 = vpack.c.bf16 %v1239_v24, %v1238_v22  ;;  %v1223_v3 = vld [vmem:[#allocation3 + $0x58] sm:$0xff]  ;;  %v1240_v25 = vld [vmem:[#allocation3 + $0xe0] sm:$0xff]  ;;  %v1241_v26 = vld [vmem:[#allocation3 + $0xe8] sm:$0xff] }
 0xc15   :  { %2046 = vmatprep.subr.bf16.mxu1 %v2045_v7  ;;  %v2059_v27 = vpack.c.bf16 %v1223_v3, %v1222_v44  ;;  %v2061_v28 = vpack.c.bf16 %v1241_v26, %v1240_v25  ;;  %v1224_v29 = vld [vmem:[#allocation3 + $0x60] sm:$0xff]  ;;  %v1225_v30 = vld [vmem:[#allocation3 + $0x68] sm:$0xff]  ;;  %v1242_v31 = vld [vmem:[#allocation3 + $0xf0] sm:$0xff] }
 0xc16   :  { %v1243_v32 = vld [vmem:[#allocation3 + $0xf8] sm:$0xff]  ;;  %v2063_v33 = vpack.c.bf16 %v1225_v30, %v1224_v29  ;;  %v1226_v35 = vld [vmem:[#allocation3 + $0x70] sm:$0xff]  ;;  %v1260_v40 = vld [vmem:[#allocation3 + $0x180] sm:$0xff] }
 0xc17   :  { %v2065_v34 = vpack.c.bf16 %v1243_v32, %v1242_v31  ;;  %v1227_v36 = vld [vmem:[#allocation3 + $0x78] sm:$0xff]  ;;  %v1261_v42 = vld [vmem:[#allocation3 + $0x188] sm:$0xff]  ;;  %v1244_v56 = vld [vmem:[#allocation3 + $0x100] sm:$0xff] }
 0xc18   :  { %2048 = vmatpush3.bf16.msra.mxu1 %v2047_v14  ;;  %v2067_v49 = vpack.c.bf16 %v1227_v36, %v1226_v35  ;;  %v2069_v55 = vpack.c.bf16 %v1261_v42, %v1260_v40  ;;  %v1245_v57 = vld [vmem:[#allocation3 + $0x108] sm:$0xff]  ;;  %v1262_v59 = vld [vmem:[#allocation3 + $0x190] sm:$0xff]  ;;  %v1263_v60 = vld [vmem:[#allocation3 + $0x198] sm:$0xff]  ;;  %v1195_v40 = vrot.slane %v2542_v50, 3 }
 0xc19   :  { %2050 = vmatprep.subr.bf16.mxu1 %v2049_v15  ;;  %v2071_v63 = vpack.c.bf16 %v1245_v57, %v1244_v56  ;;  %v2073_v0 = vpack.c.bf16 %v1263_v60, %v1262_v59  ;;  %v1246_v1 = vld [vmem:[#allocation3 + $0x110] sm:$0xff]  ;;  %v1247_v10 = vld [vmem:[#allocation3 + $0x118] sm:$0xff]  ;;  %v1264_v4 = vld [vmem:[#allocation3 + $0x1a0] sm:$0xff] }
 0xc1a   :  { %v1265_v5 = vld [vmem:[#allocation3 + $0x1a8] sm:$0xff]  ;;  %v2075_v6 = vpack.c.bf16 %v1247_v10, %v1246_v1  ;;  %v1248_v8 = vld [vmem:[#allocation3 + $0x120] sm:$0xff]  ;;  %v1266_v11 = vld [vmem:[#allocation3 + $0x1b0] sm:$0xff]  ;;  %v1196_v54 = vsel %vm729_vm6, %v1194_v39, %v1195_v40  ;;  %v1211_v10 = vsel %vm741_vm4, %v1183_v52, %v1207_v58 }
 0xc1b   :  { %v2077_v7 = vpack.c.bf16 %v1265_v5, %v1264_v4  ;;  %v1249_v9 = vld [vmem:[#allocation3 + $0x128] sm:$0xff]  ;;  %v1267_v12 = vld [vmem:[#allocation3 + $0x1b8] sm:$0xff]  ;;  %v1250_v16 = vld [vmem:[#allocation3 + $0x130] sm:$0xff] }
 0xc1c   :  { %2052 = vmatpush3.bf16.msra.mxu1 %v2051_v38  ;;  %v2079_v14 = vpack.c.bf16 %v1249_v9, %v1248_v8  ;;  %v2081_v15 = vpack.c.bf16 %v1267_v12, %v1266_v11  ;;  %v1251_v17 = vld [vmem:[#allocation3 + $0x138] sm:$0xff]  ;;  %v1268_v18 = vld [vmem:[#allocation3 + $0x1c0] sm:$0xff]  ;;  %v1269_v19 = vld [vmem:[#allocation3 + $0x1c8] sm:$0xff] }
 0xc1d   :  { %2054 = vmatprep.subr.bf16.mxu1 %v2053_v20  ;;  %v2083_v38 = vpack.c.bf16 %v1251_v17, %v1250_v16  ;;  %v2085_v20 = vpack.c.bf16 %v1269_v19, %v1268_v18  ;;  %v1252_v13 = vld [vmem:[#allocation3 + $0x140] sm:$0xff]  ;;  %v1253_v21 = vld [vmem:[#allocation3 + $0x148] sm:$0xff]  ;;  %v1270_v22 = vld [vmem:[#allocation3 + $0x1d0] sm:$0xff] }
 0xc1e   :  { %v1271_v24 = vld [vmem:[#allocation3 + $0x1d8] sm:$0xff]  ;;  %v1254_v44 = vld [vmem:[#allocation3 + $0x150] sm:$0xff]  ;;  %v1272_v25 = vld [vmem:[#allocation3 + $0x1e0] sm:$0xff] }
 0xc1f   :  { %v1255_v3 = vld [vmem:[#allocation3 + $0x158] sm:$0xff]  ;;  %v1273_v26 = vld [vmem:[#allocation3 + $0x1e8] sm:$0xff]  ;;  %v1256_v29 = vld [vmem:[#allocation3 + $0x160] sm:$0xff] }
 0xc20   :  { %2056 = vmatpush3.bf16.msra.mxu1 %v2055_v43  ;;  %v2087_v43 = vpack.c.bf16 %v1253_v21, %v1252_v13  ;;  %v1257_v30 = vld [vmem:[#allocation3 + $0x168] sm:$0xff]  ;;  %v1274_v31 = vld [vmem:[#allocation3 + $0x1f0] sm:$0xff]  ;;  %v1275_v32 = vld [vmem:[#allocation3 + $0x1f8] sm:$0xff] }
 0xc21   :  { %2058 = vmatprep.subr.bf16.mxu1 %v2057_v47  ;;  %v2089_v47 = vpack.c.bf16 %v1271_v24, %v1270_v22  ;;  %v1258_v35 = vld [vmem:[#allocation3 + $0x170] sm:$0xff]  ;;  %v1259_v36 = vld [vmem:[#allocation3 + $0x178] sm:$0xff]  ;;  %v1292_v42 = vld [vmem:[#allocation3 + $0x280] sm:$0xff] }
 0xc22   :  { %v1293_v46 = vld [vmem:[#allocation3 + $0x288] sm:$0xff]  ;;  %v2099_v48 = vpack.c.bf16 %v1259_v36, %v1258_v35  ;;  %v1276_v56 = vld [vmem:[#allocation3 + $0x200] sm:$0xff]  ;;  %v1294_v59 = vld [vmem:[#allocation3 + $0x290] sm:$0xff] }
 0xc23   :  { %v1277_v57 = vld [vmem:[#allocation3 + $0x208] sm:$0xff]  ;;  %v1295_v60 = vld [vmem:[#allocation3 + $0x298] sm:$0xff]  ;;  %v1298_v8 = vld [vmem:[#allocation3 + $0x2b0] sm:$0xff] }
 0xc24   :  { %2060 = vmatpush3.bf16.msra.mxu1 %v2059_v27  ;;  %v2091_v27 = vpack.c.bf16 %v1255_v3, %v1254_v44  ;;  %v1279_v1 = vld [vmem:[#allocation3 + $0x218] sm:$0xff]  ;;  %v1297_v4 = vld [vmem:[#allocation3 + $0x2a8] sm:$0xff]  ;;  %v1284_v18 = vld [vmem:[#allocation3 + $0x240] sm:$0xff] }
 0xc25   :  { %2062 = vmatprep.subr.bf16.mxu1 %v2061_v28  ;;  %v2093_v28 = vpack.c.bf16 %v1273_v26, %v1272_v25  ;;  %v1299_v9 = vld [vmem:[#allocation3 + $0x2b8] sm:$0xff]  ;;  %v1301_v52 = vld [vmem:[#allocation3 + $0x2c8] sm:$0xff]  ;;  %v1286_v22 = vld [vmem:[#allocation3 + $0x250] sm:$0xff] }
 0xc26   :  { %v2113_v12 = vpack.c.bf16 %v1299_v9, %v1298_v8  ;;  %v1283_v45 = vld [vmem:[#allocation3 + $0x238] sm:$0xff]  ;;  %v1285_v19 = vld [vmem:[#allocation3 + $0x248] sm:$0xff]  ;;  %v1288_v25 = vld [vmem:[#allocation3 + $0x260] sm:$0xff] }
 0xc27   :  { %v2119_v13 = vpack.c.bf16 %v1285_v19, %v1284_v18  ;;  %v1287_v24 = vld [vmem:[#allocation3 + $0x258] sm:$0xff]  ;;  %v1289_v26 = vld [vmem:[#allocation3 + $0x268] sm:$0xff]  ;;  %vm1584_vm12 = vmor %vm1583_vm10, %vm1582_vm9 }
 0xc28   :  { %2064 = vmatpush3.bf16.msra.mxu1 %v2063_v33  ;;  %v2095_v33 = vpack.c.bf16 %v1257_v30, %v1256_v29  ;;  %v2123_v44 = vpack.c.bf16 %v1287_v24, %v1286_v22  ;;  %v2127_v29 = vpack.c.bf16 %v1289_v26, %v1288_v25 }
 0xc29   :  { %2066 = vmatprep.subr.bf16.mxu1 %v2065_v34  ;;  %v2097_v34 = vpack.c.bf16 %v1275_v32, %v1274_v31  ;;  %v1290_v31 = vld [vmem:[#allocation3 + $0x270] sm:$0xff]  ;;  %v1291_v32 = vld [vmem:[#allocation3 + $0x278] sm:$0xff] }
 0xc2c   :  { %2068 = vmatpush3.bf16.msra.mxu1 %v2067_v49  ;;  %v1190_v49 = vrot.slane %v2538_v41, 1  ;;  %v1631_v41 = vld [vmem:[%s2617_s13] ss:$0 sm:$0xff] }
 0xc2d   :  { %2070 = vmatprep.subr.bf16.mxu1 %v2069_v55  ;;  %v2101_v55 = vpack.c.bf16 %v1293_v46, %v1292_v42 }
 0xc2e   :  { %v1202_v61 = vsel %vm741_vm4, %v1190_v49, %v1196_v54 }
 0xc2f   :  { %1373 = vmatmul.mubr.f32.vlgmr.msra.gmra.mrb[14].mxu1 %v1188_v62  ;;  %v2103_v62 = vpack.c.bf16 %v1277_v57, %v1276_v56 }
 0xc30   :  { %2072 = vmatpush3.bf16.msra.mxu1 %v2071_v63  ;;  %1442 = vmatprep.mubr.f32.mxu1 %v1203_v2  ;;  %v2105_v63 = vpack.c.bf16 %v1295_v60, %v1294_v59  ;;  %v1296_v2 = vld [vmem:[#allocation3 + $0x2a0] sm:$0xff] }
 0xc31   :  { %2074 = vmatprep.subr.bf16.mxu1 %v2073_v0  ;;  %v1278_v0 = vld [vmem:[#allocation3 + $0x210] sm:$0xff]  ;;  %v2109_v51 = vpack.c.bf16 %v1297_v4, %v1296_v2  ;;  %v2261_v4 = vmov 1983009808  }
 0xc32   :  { %v2107_v5 = vpack.c.bf16 %v1279_v1, %v1278_v0 }
 0xc34   :  { %2076 = vmatpush3.bf16.msra.mxu1 %v2075_v6  ;;  %v1280_v6 = vld [vmem:[#allocation3 + $0x220] sm:$0xff] }
 0xc35   :  { %2078 = vmatprep.subr.bf16.mxu1 %v2077_v7  ;;  %v1281_v7 = vld [vmem:[#allocation3 + $0x228] sm:$0xff] }
 0xc36   :  { %v2111_v11 = vpack.c.bf16 %v1281_v7, %v1280_v6 }
 0xc38   :  { %2080 = vmatpush3.bf16.msra.mxu1 %v2079_v14  ;;  %v1282_v14 = vld [vmem:[#allocation3 + $0x230] sm:$0xff] }
 0xc39   :  { %2082 = vmatprep.subr.bf16.mxu1 %v2081_v15  ;;  %v1300_v15 = vld [vmem:[#allocation3 + $0x2c0] sm:$0xff]  ;;  %v2115_v16 = vpack.c.bf16 %v1283_v45, %v1282_v14 }
 0xc3a   :  { %v2117_v17 = vpack.c.bf16 %v1301_v52, %v1300_v15 }
 0xc3c   :  { %2084 = vmatpush3.bf16.msra.mxu1 %v2083_v38  ;;  %v1302_v38 = vld [vmem:[#allocation3 + $0x2d0] sm:$0xff] }
 0xc3d   :  { %2086 = vmatprep.subr.bf16.mxu1 %v2085_v20  ;;  %v1303_v20 = vld [vmem:[#allocation3 + $0x2d8] sm:$0xff] }
 0xc3e   :  { %v2121_v21 = vpack.c.bf16 %v1303_v20, %v1302_v38 }
 0xc40   :  { %2088 = vmatpush3.bf16.msra.mxu1 %v2087_v43  ;;  %v1304_v43 = vld [vmem:[#allocation3 + $0x2e0] sm:$0xff] }
 0xc41   :  { %2090 = vmatprep.subr.bf16.mxu1 %v2089_v47  ;;  %v1305_v47 = vld [vmem:[#allocation3 + $0x2e8] sm:$0xff] }
 0xc42   :  { %v2125_v3 = vpack.c.bf16 %v1305_v47, %v1304_v43 }
 0xc44   :  { %2092 = vmatpush3.bf16.msra.mxu1 %v2091_v27  ;;  %v1306_v27 = vld [vmem:[#allocation3 + $0x2f0] sm:$0xff] }
 0xc45   :  { %2094 = vmatprep.subr.bf16.mxu1 %v2093_v28  ;;  %v1307_v28 = vld [vmem:[#allocation3 + $0x2f8] sm:$0xff] }
 0xc46   :  { %v2129_v30 = vpack.c.bf16 %v1307_v28, %v1306_v27 }
 0xc48   :  { %2096 = vmatpush3.bf16.msra.mxu1 %v2095_v33  ;;  %v2131_v33 = vpack.c.bf16 %v1291_v32, %v1290_v31 }
 0xc49   :  { %2098 = vmatprep.subr.bf16.mxu1 %v2097_v34  ;;  %v1206_v34 = vrot.slane %v2542_v50, 4  ;;  %v1630_v50 = vld [vmem:[%s2616_s12] ss:$0 sm:$0xff]  ;;  %s2262_s12 = smov [#allocation5]  }
 0xc4a   :  { %s1592_s13 = sshll.u32 %s2262_s12, 4  ;;  %s1593_s13 = int_to_ptr.vmem [resolvable:$true] %s1592_s13 }
 0xc4b   :  { %v1210_v35 = vsel %vm741_vm4, %v1180_v37, %v1206_v34  ;;  %s2226_s19 = scalar_lea.vmem %s1593_s13, 64  ;;  %p2231_p3 = scmp.lt.s32.totalorder %s1593_s13, %s1593_s13 }
 0xc4c   :  { %2100 = vmatpush3.bf16.msra.mxu1 %v2099_v48  ;;  %p2227_p2 = scmp.ne.s32.totalorder %s1593_s13, %s2226_s19  ;;  %p2232_p4 = scmp.lt.s32.totalorder %s2226_s19, %s2226_s19 }
 0xc4d   :  { %2102 = vmatprep.subr.bf16.mxu1 %v2101_v55 }
 0xc4e   :  { %p2233_p5 = por %p2232_p4, %p2231_p3 }
 0xc4f   :  { %1443 = vmatmul.mubr.f32.vlgmr.msra.gmra.mrb[16].mxu1 %v1202_v61 }
 0xc50   :  { %2104 = vmatpush3.bf16.msra.mxu1 %v2103_v62  ;;  %1512 = vmatprep.mubr.f32.mxu1 %v1211_v10  ;;  %p2234_p6 = pnand %p2233_p5, %p2227_p2 }
 0xc51   :  { %2106 = vmatprep.subr.bf16.mxu1 %v2105_v63 }
 0xc54   :  { %2108 = vmatpush3.bf16.msra.mxu1 %v2107_v5  ;;  %v1558_v5 = vunpack.c.l.s4 %v2261_v4 }
 0xc55   :  { %2110 = vmatprep.subr.bf16.mxu1 %v2109_v51 }
 0xc56   :  { %v1559_v9 = vunpack.c.0.s8 %v1558_v5 }
 0xc58   :  { %2112 = vmatpush3.bf16.msra.mxu1 %v2111_v11  ;;  %v1562_v45 = vsub.s32 %v1559_v9, %v2528_v23 }
 0xc59   :  { %2114 = vmatprep.subr.bf16.mxu1 %v2113_v12 }
 0xc5a   :  { %v1563_v18 = vrot.slane %v2493_v53, %v1562_v45 }
 0xc5c   :  { %2116 = vmatpush3.bf16.msra.mxu1 %v2115_v16 }
 0xc5d   :  { %2118 = vmatprep.subr.bf16.mxu1 %v2117_v17 }
 0xc60   :  { %2120 = vmatpush3.bf16.msra.mxu1 %v2119_v13 }
 0xc61   :  { %2122 = vmatprep.subr.bf16.mxu1 %v2121_v21 }
 0xc64   :  { %2124 = vmatpush3.bf16.msra.mxu1 %v2123_v44 }
 0xc65   :  { %2126 = vmatprep.subr.bf16.mxu1 %v2125_v3 }
 0xc68   :  { %2128 = vmatpush3.bf16.msra.mxu1 %v2127_v29 }
 0xc69   :  { %2130 = vmatprep.subr.bf16.mxu1 %v2129_v30 }
 0xc6c   :  { %2132 = vmatpush3.bf16.msra.mxu1 %v2131_v33 }
 0xc6f   :  { %1513 = vmatmul.mubr.f32.vlgmr.msra.gmra.mrb[18].mxu1 %v1210_v35 }
 0xd02   :  { %v1699_v36 = vpop.f32.mrb[14].mxu1 }
 0xd03   :  { %v1700_v39 = vpop.f32.mrb[15].mxu1 }
 0xd04   :  { %v1701_v40 = vadd.f32 %v1700_v39, %v1699_v36 }
 0xd22   :  { %v1734_v42 = vpop.f32.mrb[16].mxu1 }
 0xd23   :  { %v1735_v46 = vpop.f32.mrb[17].mxu1 }
 0xd24   :  { %v1736_v48 = vadd.f32 %v1735_v46, %v1734_v42 }
 0xd26   :  { %v1445_v49 = vadd.f32 %v1736_v48, %v1701_v40 }
 0xd42   :  { %v1769_v54 = vpop.f32.mrb[18].mxu1 }
 0xd43   :  { %v1770_v55 = vpop.f32.mrb[19].mxu1 }
 0xd44   :  { %v1771_v56 = vadd.f32 %v1770_v55, %v1769_v54 }
 0xd46   :  { %v1515_v57 = vadd.f32 %v1771_v56, %v1445_v49 }
 0xd48   :  { %v1525_v37 = vmul.f32 %v1630_v50, %v1515_v57 }
 0xd4a   :  { %v1533_v58 = vadd.f32 %v1631_v41, %v1525_v37 }
 0xd4c   :  { %v1534_v59 = vmax.f32 %v1533_v58, 0.0 }
 0xd4e   :  { %v1535_v60 = vsel %vm741_vm4, %v1534_v59, 0.0  ;;  %v1545_v61 = vrot.slane %v1534_v59, 4 }
 0xd4f   :  { %v1536_v62 = vrot.slane %v1535_v60, 4 }
 0xd50   :  { %v1547_v63 = vsel %vm741_vm4, %v1545_v61, 0.0 }
 0xd51   :  { %v1537_v0 = vadd.f32 %v1536_v62, %v1535_v60  ;;  %v1548_v1 = vrot.slane %v1547_v63, 4 }
 0xd53   :  { %v1538_v10 = vrot.slane %v1537_v0, 2  ;;  %v1549_v2 = vadd.f32 %v1548_v1, %v1547_v63 }
 0xd55   :  { %v1539_v51 = vadd.f32 %v1538_v10, %v1537_v0  ;;  %v1550_v6 = vrot.slane %v1549_v2, 2 }
 0xd57   :  { %v1540_v7 = vrot.slane %v1539_v51, 1  ;;  %v1551_v8 = vadd.f32 %v1550_v6, %v1549_v2 }
 0xd59   :  { %v1541_v11 = vadd.f32 %v1540_v7, %v1539_v51  ;;  %v1552_v12 = vrot.slane %v1551_v8, 1 }
 0xd5b   :  { %v1553_v14 = vadd.f32 %v1552_v12, %v1551_v8  ;;  %v1543_v15 = vmul.f32 0.25, %v1541_v11 }
 0xd5d   :  { %v1554_v52 = vmul.f32 0.25, %v1553_v14 }
 0xd5f   :  { %v1555_v16 = vsel %vm734_vm7, %v1543_v15, %v1554_v52 }
 0xd60   :  { %v1576_v17 = vrot.slane %v1555_v16, %v1562_v45 }
 0xd62   :  { %1577 = vrot.lane.b32.xlu0 %v1576_v17, %s2257_s29 }
 0xd66   :  { %1564 = vrot.lane.b32.xlu0 %v1563_v18, %s2258_s17 }
 0xdd4   :  { %v1578_v19 = vpop.permute.xlu0 %1577 }
 0xdd5   :  { %v1579_v38 = vrot.slane %v1578_v19, 6 }
 0xdd7   :  { %v1580_v20 = vsel %vm182_vm2, %v1579_v38, %v1578_v19 }
 0xdd8   :  { %v1565_v23 = vpop.permute.xlu0 %1564 }
 0xdd9   :  { %1568 = vst.msk [vmem:[#allocation5] sm:$0x3] %vm1567_vm11, %v1565_v23 }
 0xdda   :  { %1585 = vst.msk [vmem:[#allocation5] sm:$0xf] %vm1584_vm12, %v1580_v20 }
 0xddb   :  { %2237 = shalt.err (!%p2234_p6)
}
 0xddc   :  { %s2238_s20 = scalar_lea.hbm %s2618_s14, 64 }
 0xddd   :  { %p2239_p7 = scmp.ne.s32.totalorder %s2618_s14, %s2238_s20  ;;  %p2242_p8 = scmp.lt.u32.totalorder %s2238_s20, %s2618_s14 }
 0xddf   :  { %p2244_p9 = pnand %p2242_p8, %p2239_p7 }
 0xde1   :  { %2247 = shalt.err (!%p2244_p9)
}
 0xde2   :  { %1595 = dma.vmem_to_hbm [thread:$0]  %s1593_s13, 64, %s2618_s14, [#allocation6]  }
 0xde3   :  { %2252 = dma.done.wait [#allocation6], 64  }
 0xde4   :  { %2253 = vsyncadd [#allocation6], 4294967232 }
 0xde5   :  { %1599 = vsyncpa [#allocation6], 1 }
 0xde6   :  { %1600 = vsyncmov [#allocation4] }
 0xde9   :  { %s1601_s26 = vpop.sfrf %1600 }
 0xdea   :  { %p1632_p10 = scmp.ne.s32.totalorder %s1601_s26, 0 }
 0xdec   :  { %1605 = shalt.err (%p1632_p10)  }
 0xded   :  { %1607 = vsyncmov [#allocation4 + $0x1] }
 0xdf0   :  { %s1608_s27 = vpop.sfrf %1607 }
 0xdf1   :  { %p1633_p11 = scmp.ne.s32.totalorder %s1608_s27, 0 }
 0xdf3   :  { %1612 = shalt.err (%p1633_p11)  }

</bundles_post_ra>
